<compile_context>
chip_gen: v7x
topology: tpu7x:2x2x1
jax: 0.10.0
libtpu: 0.0.40
codegen_flags: <defaults>
</compile_context>

<pallas_src>
import jax
import jax.numpy as jnp
from jax.experimental import pallas as pl
from jax.experimental.pallas import tpu as pltpu

# ----------------------------- configuration --------------------------------
B = 2
IN_CHANS = 3
IMG = 16
PATCH = 8
GRID_HW = IMG // PATCH
N_PATCH = GRID_HW * GRID_HW              # 4 tokens per image
ROWS = B * N_PATCH                       # 8 folded token rows
K_PATCH = IN_CHANS * PATCH * PATCH       # 192
EMBED = 32
HEADS = 4
HEAD_DIM = EMBED // HEADS                # 8
MLP_HIDDEN = 4 * EMBED                   # 128
NUM_SAB = 2
NUM_TAB = 1
NUM_BLOCKS = NUM_SAB + NUM_TAB           # 3 transformer blocks total
NB_CLASSES_PER_TASK = [4, 3]             # after one update_model(3)
NUM_TASKS = len(NB_CLASSES_PER_TASK)
TOTAL_CLASSES = sum(NB_CLASSES_PER_TASK)
PAD_CLASSES = 128                        # lane-dense classifier output
OUT_ROWS = 8                             # sublane-dense output
TB = NUM_TASKS * B                       # 4 stacked task-token rows
NKEY = TB + ROWS                         # 12 joint TAB keys
EPS = 1e-5
SCALE = HEAD_DIM ** -0.5
NEG_INF = -1e30

# ----------------------------- slab layouts ----------------------------------
# 32-lane weight slab: patch-embed weight + per-block (wproj, w2)
R32_BLK = K_PATCH                        # per-block base
R32_STRIDE = EMBED + MLP_HIDDEN          # 160 rows per block (wproj 32 + w2 128)
R32_TOTAL = K_PATCH + NUM_BLOCKS * R32_STRIDE          # 672
# 96-lane weight slab: fused QKV weight per block
R96_TOTAL = NUM_BLOCKS * EMBED                         # 96
# 128-lane weight slab: per-block w1 + fused block-diagonal classifier weight
R128_CLF = NUM_BLOCKS * EMBED                          # 96
R128_TOTAL = R128_CLF + NUM_TASKS * EMBED              # 160
# 128-lane "vector" slab
V_POS = 0                                # 8 rows  : pos + patch bias (batch tiled)
V_SABM = V_POS + ROWS                    # 32 rows : SAB batch mask (head tiled)
V_TABM = V_SABM + HEADS * ROWS           # 16 rows : TAB joint mask (head tiled)
V_TAIL = V_TABM + HEADS * TB             # 16 rows : tokens / clf LN / clf bias
V_BLK = V_TAIL + 16                      # 3 x 8 rows of per-block vectors
VEC_ROWS = V_BLK + NUM_BLOCKS * 8        # 96


# ------------------------------ kernel helpers -------------------------------
def _ln(x, g, b):
    # PyTorch LayerNorm: biased variance, eps=1e-5; g/b broadcast over rows.
    mu = jnp.mean(x, axis=-1, keepdims=True)
    var = jnp.mean((x - mu) ** 2, axis=-1, keepdims=True)
    return (x - mu) * jax.lax.rsqrt(var + EPS) * g + b


def _dot(a, b):
    return jnp.dot(a, b, preferred_element_type=jnp.float32)


def _dot_t(a, b):
    # a @ b.T without an explicit transpose op
    return jax.lax.dot_general(a, b, (((1,), (1,)), ((), ())),
                               preferred_element_type=jnp.float32)


# ------------------------------- fused kernel ---------------------------------
def _dytox_kernel(patches_ref, w32_ref, w96_ref, w128_ref, vec_ref, o_ref):
    def blk_weights(i):
        b32 = R32_BLK + i * R32_STRIDE
        v = vec_ref[V_BLK + i * 8:V_BLK + (i + 1) * 8, :]            # (8, 128)
        return dict(
            w_qkv=w96_ref[i * EMBED:(i + 1) * EMBED, :],             # (32, 96)
            w_p=w32_ref[b32:b32 + EMBED, :],                         # (32, 32)
            w_1=w128_ref[i * EMBED:(i + 1) * EMBED, :],              # (32, 128)
            w_2=w32_ref[b32 + EMBED:b32 + EMBED + MLP_HIDDEN, :],    # (128, 32)
            ln1_g=v[0:1, 0:EMBED], ln1_b=v[1:2, 0:EMBED],
            b_qkv=v[2:3, 0:3 * EMBED], b_p=v[3:4, 0:EMBED],
            ln2_g=v[4:5, 0:EMBED], ln2_b=v[5:6, 0:EMBED],
            b_1=v[6:7, 0:MLP_HIDDEN], b_2=v[7:8, 0:EMBED])

    def mha(q, keys, vals, mask, wb):
        # q pre-scaled (SCALE folded into the Q weight/bias offline).
        nq = q.shape[0]
        # one stacked score matrix / softmax for all heads
        s = jnp.concatenate(
            [_dot_t(q[:, o:o + HEAD_DIM], keys[:, o:o + HEAD_DIM])
             for o in range(0, EMBED, HEAD_DIM)], axis=0)            # (H*nq, nk)
        s = s + mask
        m = jnp.max(s, axis=-1, keepdims=True)
        e = jnp.exp(s - m)
        p = e * pl.reciprocal(jnp.sum(e, axis=-1, keepdims=True), approx=True)
        # head contexts lane-concatenated -> single projection matmul
        ctx = jnp.concatenate(
            [_dot(p[h * nq:(h + 1) * nq, :],
                  vals[:, h * HEAD_DIM:(h + 1) * HEAD_DIM])
             for h in range(HEADS)], axis=1)                         # (nq, C)
        return _dot(ctx, wb["w_p"]) + wb["b_p"]

    def mlp(y, wb):
        h = _ln(y, wb["ln2_g"], wb["ln2_b"])
        h = jax.nn.gelu(_dot(h, wb["w_1"]) + wb["b_1"])              # tanh GELU
        return y + _dot(h, wb["w_2"]) + wb["b_2"]

    # ---- patch embed (Conv2d stride=P as one matmul) + (pos + bias) ----
    x = _dot(patches_ref[...], w32_ref[0:K_PATCH, :]) \
        + vec_ref[V_POS:V_POS + ROWS, 0:EMBED]                       # (ROWS, C)

    # ---- self-attention blocks, batch folded into rows ----
    sab_mask = vec_ref[V_SABM:V_SABM + HEADS * ROWS, 0:ROWS]         # (32, 8)
    for i in range(NUM_SAB):
        wb = blk_weights(i)
        h = _ln(x, wb["ln1_g"], wb["ln1_b"])
        qkv = _dot(h, wb["w_qkv"]) + wb["b_qkv"]                     # (ROWS, 96)
        x = x + mha(qkv[:, 0:EMBED], qkv[:, EMBED:2 * EMBED],
                    qkv[:, 2 * EMBED:], sab_mask, wb)
        x = mlp(x, wb)

    # ---- task-attention block: ALL task tokens as one (T*B, C) slab ----
    wb = blk_weights(NUM_SAB)
    tails = vec_ref[V_TAIL:V_TAIL + 16, :]                           # (16, 128)
    tok = tails[0:TB, 0:EMBED]                                       # (TB, C)
    # shared K/V of the patch tokens (identical for every task token)
    kvx = _dot(_ln(x, wb["ln1_g"], wb["ln1_b"]), wb["w_qkv"]) + wb["b_qkv"]
    qkvt = _dot(_ln(tok, wb["ln1_g"], wb["ln1_b"]), wb["w_qkv"]) + wb["b_qkv"]
    keys = jnp.concatenate([qkvt[:, EMBED:2 * EMBED],
                            kvx[:, EMBED:2 * EMBED]], axis=0)        # (NKEY, C)
    vals = jnp.concatenate([qkvt[:, 2 * EMBED:],
                            kvx[:, 2 * EMBED:]], axis=0)             # (NKEY, C)
    tab_mask = vec_ref[V_TABM:V_TABM + HEADS * TB, 0:NKEY]           # (16, 12)
    cls = tok + mha(qkvt[:, 0:EMBED], keys, vals, tab_mask, wb)
    cls = mlp(cls, wb)                                               # (TB, C)

    # ---- fused ContinualClassifier heads (block-diagonal, lane-dense) ----
    hn = _ln(cls, tails[TB:2 * TB, 0:EMBED], tails[2 * TB:3 * TB, 0:EMBED])
    h_cat = jnp.concatenate([hn[t * B:(t + 1) * B, :]
                             for t in range(NUM_TASKS)], axis=1)     # (B, T*C)
    out = _dot(h_cat, w128_ref[R128_CLF:R128_CLF + NUM_TASKS * EMBED, :]) \
        + tails[3 * TB:3 * TB + 1, :]                                # (B, 128)
    o_ref[...] = jnp.concatenate(
        [out, jnp.zeros((OUT_ROWS - B, PAD_CLASSES), jnp.float32)], axis=0)


# ------------------------------- wrapper ---------------------------------------
_VMEM_SPEC = pl.BlockSpec(memory_space=pltpu.MemorySpace.VMEM)


def extract_patches(x):
    # NCHW -> (B*N, C_in * P * P)   (matches Conv2d(stride=P).flatten(2).T(1,2))
    p = x.reshape(B, IN_CHANS, GRID_HW, PATCH, GRID_HW, PATCH)
    p = p.transpose(0, 2, 4, 1, 3, 5)
    return p.reshape(B * N_PATCH, K_PATCH)


@jax.jit
def dytox_forward(x, packed):
    patches = extract_patches(x)
    out = pl.pallas_call(
        _dytox_kernel,
        out_shape=jax.ShapeDtypeStruct((OUT_ROWS, PAD_CLASSES), jnp.float32),
        in_specs=[_VMEM_SPEC] * 5,
        out_specs=_VMEM_SPEC,
    )(patches, *packed)
    # self.training is False / head_div is None -> no 'div' entry
    return {"logits": out[:B, :TOTAL_CLASSES]}


# ------------------------ one-time parameter packing ---------------------------
def _fused_qkv(blk):
    """Fused (C, 3C) QKV weight / (3C,) bias with SCALE folded into Q."""
    if "wqkv" in blk:
        wt = blk["wqkv"].T
        bt = blk["bqkv"]
    else:
        wt = jnp.concatenate([blk["wq"].T, blk["wk"].T, blk["wv"].T], axis=1)
        bt = jnp.concatenate([blk["bq"], blk["bk"], blk["bv"]])
    scale = jnp.concatenate([jnp.full((EMBED,), SCALE, jnp.float32),
                             jnp.ones((2 * EMBED,), jnp.float32)])
    return wt * scale[None, :], bt * scale


def prepare_params(p):
    """Pack everything into 4 contiguous, lane-dense VMEM slabs (done once)."""
    f32 = jnp.float32
    w32 = jnp.zeros((R32_TOTAL, EMBED), f32)
    w96 = jnp.zeros((R96_TOTAL, 3 * EMBED), f32)
    w128 = jnp.zeros((R128_TOTAL, MLP_HIDDEN), f32)
    vec = jnp.zeros((VEC_ROWS, PAD_CLASSES), f32)

    # patch-embed weight (Conv2d stride=P as matmul)
    w32 = w32.at[0:K_PATCH, :].set(p["patch_w"].reshape(EMBED, -1).T)

    blocks = list(p["sabs"]) + list(p["tabs"])
    for i, blk in enumerate(blocks):
        wqkv, bqkv = _fused_qkv(blk)
        b32 = R32_BLK + i * R32_STRIDE
        w96 = w96.at[i * EMBED:(i + 1) * EMBED, :].set(wqkv)
        w32 = w32.at[b32:b32 + EMBED, :].set(blk["wproj"].T)
        w32 = w32.at[b32 + EMBED:b32 + EMBED + MLP_HIDDEN, :].set(blk["w2"].T)
        w128 = w128.at[i * EMBED:(i + 1) * EMBED, :].set(blk["w1"].T)
        r = V_BLK + i * 8
        vec = vec.at[r + 0, 0:EMBED].set(blk["ln1_g"].reshape(-1))
        vec = vec.at[r + 1, 0:EMBED].set(blk["ln1_b"].reshape(-1))
        vec = vec.at[r + 2, 0:3 * EMBED].set(bqkv.reshape(-1))
        vec = vec.at[r + 3, 0:EMBED].set(blk["bproj"].reshape(-1))
        vec = vec.at[r + 4, 0:EMBED].set(blk["ln2_g"].reshape(-1))
        vec = vec.at[r + 5, 0:EMBED].set(blk["ln2_b"].reshape(-1))
        vec = vec.at[r + 6, 0:MLP_HIDDEN].set(blk["b1"].reshape(-1))
        vec = vec.at[r + 7, 0:EMBED].set(blk["b2"].reshape(-1))

    # pos embed + patch bias, pre-tiled over the batch
    pos = jnp.tile(p["pos_embed"][0], (B, 1)) + p["patch_b"].reshape(1, -1)
    vec = vec.at[V_POS:V_POS + ROWS, 0:EMBED].set(pos)

    # block-diagonal batch mask for the SABs (tiled over heads)
    ridx = jnp.arange(ROWS)
    sab_mask = jnp.where((ridx[:, None] // N_PATCH) == (ridx[None, :] // N_PATCH),
                         0.0, NEG_INF).astype(f32)
    vec = vec.at[V_SABM:V_SABM + HEADS * ROWS, 0:ROWS].set(
        jnp.tile(sab_mask, (HEADS, 1)))

    # joint TAB mask: task-token row r (task=r//B, batch=r%B) sees itself plus
    # the patch tokens of its own image only.
    rr = jnp.arange(TB)
    cc = jnp.arange(NKEY)
    own_tok = cc[None, :] == rr[:, None]
    own_img = (cc[None, :] >= TB) & \
              (((cc[None, :] - TB) // N_PATCH) == (rr[:, None] % B))
    tab_mask = jnp.where(own_tok | own_img, 0.0, NEG_INF).astype(f32)
    vec = vec.at[V_TABM:V_TABM + HEADS * TB, 0:NKEY].set(
        jnp.tile(tab_mask, (HEADS, 1)))

    # task tokens + classifier LN params, task-major & batch-tiled
    toks = jnp.concatenate([jnp.tile(t.reshape(1, EMBED), (B, 1))
                            for t in p["task_tokens"]], axis=0)
    cg = jnp.concatenate([jnp.tile(h["norm_g"].reshape(1, EMBED), (B, 1))
                          for h in p["heads"]], axis=0)
    cb = jnp.concatenate([jnp.tile(h["norm_b"].reshape(1, EMBED), (B, 1))
                          for h in p["heads"]], axis=0)
    vec = vec.at[V_TAIL:V_TAIL + TB, 0:EMBED].set(toks)
    vec = vec.at[V_TAIL + TB:V_TAIL + 2 * TB, 0:EMBED].set(cg)
    vec = vec.at[V_TAIL + 2 * TB:V_TAIL + 3 * TB, 0:EMBED].set(cb)

    # fused block-diagonal classifier weight / bias (lane-dense, 128 wide)
    off = 0
    for t, h in enumerate(p["heads"]):
        nc = h["w"].shape[0]
        w128 = w128.at[R128_CLF + t * EMBED:R128_CLF + (t + 1) * EMBED,
                       off:off + nc].set(h["w"].T)
        vec = vec.at[V_TAIL + 3 * TB, off:off + nc].set(h["b"])
        off += nc

    return (w32, w96, w128, vec)


# ---------------------------- parameter init ----------------------------------
def init_params(key):
    keys = iter(jax.random.split(key, 128))
    nrm = lambda shape: 0.02 * jax.random.normal(next(keys), shape, jnp.float32)
    ones = lambda: jnp.ones((1, EMBED), jnp.float32)
    zeros = lambda: jnp.zeros((1, EMBED), jnp.float32)
    p = {
        "patch_w": nrm((EMBED, IN_CHANS, PATCH, PATCH)),
        "patch_b": nrm((EMBED,)),
        "pos_embed": nrm((1, N_PATCH, EMBED)),
        "task_tokens": [nrm((1, 1, EMBED)) for _ in range(NUM_TASKS)],
        "sabs": [],
        "tabs": [],
        "heads": [],
    }
    for _ in range(NUM_SAB):
        p["sabs"].append(dict(
            ln1_g=ones(), ln1_b=zeros(),
            wqkv=nrm((3 * EMBED, EMBED)), bqkv=nrm((3 * EMBED,)),
            wproj=nrm((EMBED, EMBED)), bproj=nrm((EMBED,)),
            ln2_g=ones(), ln2_b=zeros(),
            w1=nrm((MLP_HIDDEN, EMBED)), b1=nrm((MLP_HIDDEN,)),
            w2=nrm((EMBED, MLP_HIDDEN)), b2=nrm((EMBED,)),
        ))
    for _ in range(NUM_TAB):
        p["tabs"].append(dict(
            ln1_g=ones(), ln1_b=zeros(),
            wq=nrm((EMBED, EMBED)), bq=nrm((EMBED,)),
            wk=nrm((EMBED, EMBED)), bk=nrm((EMBED,)),
            wv=nrm((EMBED, EMBED)), bv=nrm((EMBED,)),
            wproj=nrm((EMBED, EMBED)), bproj=nrm((EMBED,)),
            ln2_g=ones(), ln2_b=zeros(),
            w1=nrm((MLP_HIDDEN, EMBED)), b1=nrm((MLP_HIDDEN,)),
            w2=nrm((EMBED, MLP_HIDDEN)), b2=nrm((EMBED,)),
        ))
    for nc in NB_CLASSES_PER_TASK:
        p["heads"].append(dict(norm_g=ones(), norm_b=zeros(),
                               w=nrm((nc, EMBED)), b=nrm((nc,))))
    return p


# ------------------------- pure-JAX reference ----------------------------------
def _ln_ref(x, g, b):
    mu = x.mean(-1, keepdims=True)
    var = ((x - mu) ** 2).mean(-1, keepdims=True)
    return (x - mu) / jnp.sqrt(var + EPS) * g.reshape(-1) + b.reshape(-1)


def _sab_ref(x, blk):
    Bx, Nx, Cx = x.shape
    h = _ln_ref(x, blk["ln1_g"], blk["ln1_b"])
    qkv = h @ blk["wqkv"].T + blk["bqkv"]
    qkv = qkv.reshape(Bx, Nx, 3, HEADS, HEAD_DIM).transpose(2, 0, 3, 1, 4)
    q, k, v = qkv[0], qkv[1], qkv[2]
    att = jax.nn.softmax(jnp.einsum("bhqd,bhkd->bhqk", q, k) * SCALE, axis=-1)
    o = jnp.einsum("bhqk,bhkd->bhqd", att, v).transpose(0, 2, 1, 3).reshape(Bx, Nx, Cx)
    x = x + (o @ blk["wproj"].T + blk["bproj"])
    h2 = jax.nn.gelu(_ln_ref(x, blk["ln2_g"], blk["ln2_b"]) @ blk["w1"].T + blk["b1"])
    return x + (h2 @ blk["w2"].T + blk["b2"])


def _tab_ref(tok, x, blk):
    Bx = x.shape[0]
    u = jnp.concatenate([tok, x], axis=1)
    h = _ln_ref(u, blk["ln1_g"], blk["ln1_b"])
    q = (h[:, :1] @ blk["wq"].T + blk["bq"]).reshape(Bx, 1, HEADS, HEAD_DIM).transpose(0, 2, 1, 3)
    k = (h @ blk["wk"].T + blk["bk"]).reshape(Bx, -1, HEADS, HEAD_DIM).transpose(0, 2, 1, 3)
    v = (h @ blk["wv"].T + blk["bv"]).reshape(Bx, -1, HEADS, HEAD_DIM).transpose(0, 2, 1, 3)
    att = jax.nn.softmax(jnp.einsum("bhqd,bhkd->bhqk", q * SCALE, k), axis=-1)
    o = jnp.einsum("bhqk,bhkd->bhqd", att, v).transpose(0, 2, 1, 3).reshape(Bx, 1, EMBED)
    cls = (o @ blk["wproj"].T + blk["bproj"]) + tok
    h2 = jax.nn.gelu(_ln_ref(cls, blk["ln2_g"], blk["ln2_b"]) @ blk["w1"].T + blk["b1"])
    return cls + (h2 @ blk["w2"].T + blk["b2"])


def reference_forward(x, p):
    patches = extract_patches(x).reshape(B, N_PATCH, K_PATCH)
    wt = p["patch_w"].reshape(EMBED, -1).T
    xseq = patches @ wt + p["patch_b"] + p["pos_embed"]
    for blk in p["sabs"]:
        xseq = _sab_ref(xseq, blk)
    tokens = []
    for tt in p["task_tokens"]:
        task_tok = jnp.broadcast_to(tt, (B, 1, EMBED))
        for blk in p["tabs"]:
            task_tok = _tab_ref(task_tok, xseq, blk)
        tokens.append(task_tok)
    tokens = jnp.concatenate(tokens, axis=1)
    logits = [_ln_ref(tokens[:, i], h["norm_g"], h["norm_b"]) @ h["w"].T + h["b"]
              for i, h in enumerate(p["heads"])]
    return jnp.concatenate(logits, axis=1)


# ----------------------------------- main --------------------------------------
if __name__ == "__main__":
    key = jax.random.PRNGKey(0)
    k_x, k_p = jax.random.split(key)
    x = jax.random.normal(k_x, (B, IN_CHANS, IMG, IMG), jnp.float32)
    params = init_params(k_p)
    packed = prepare_params(params)

    out = dytox_forward(x, packed)
    logits = out["logits"]
    jax.block_until_ready(logits)

    assert logits.shape == (B, TOTAL_CLASSES), logits.shape
    ref = reference_forward(x, params)
    err = float(jnp.max(jnp.abs(logits - ref)))
    assert err < 5e-3, f"mismatch vs reference: {err}"
    # TODO(synk): training-mode divergence head ('div' output) is not exercised
    # in the inference forward (head_div is None here).
    # TODO(synk): jax.nn.gelu uses the tanh approximation (PyTorch nn.GELU is
    # exact erf); kernel and reference match each other, differing ~1e-3 vs torch.
    print("KERNEL_OK")
</pallas_src>

<mosaic_0001>
module attributes {stable_mosaic.version = 11 : i64} {
  func.func @_dytox_kernel(%arg0: memref<8x192xf32, #tpu.memory_space<vmem>>, %arg1: memref<672x32xf32, #tpu.memory_space<vmem>>, %arg2: memref<96x96xf32, #tpu.memory_space<vmem>>, %arg3: memref<160x128xf32, #tpu.memory_space<vmem>>, %arg4: memref<96x128xf32, #tpu.memory_space<vmem>>, %arg5: memref<8x128xf32, #tpu.memory_space<vmem>>) attributes {dimension_semantics = [], scalar_prefetch = 0 : i64, scratch_operands = 0 : i64, tpu.core_type = #tpu.core_type<tc>} {
    %c0 = arith.constant 0 : index
    %c0_0 = arith.constant 0 : index
    %0 = vector.load %arg0[%c0, %c0_0] : memref<8x192xf32, #tpu.memory_space<vmem>>, vector<8x192xf32>
    %c0_1 = arith.constant 0 : index
    %c0_2 = arith.constant 0 : index
    %1 = vector.load %arg1[%c0_1, %c0_2] : memref<672x32xf32, #tpu.memory_space<vmem>>, vector<192x32xf32>
    %cst = arith.constant dense<0.000000e+00> : vector<8x32xf32>
    %2 = tpu.matmul %0, %1, %cst {dimension_numbers = #tpu.dot_dimension_numbers<[1], [0], [0], [1], [0, 0, 1, 1], [], []>} : vector<8x192xf32>, vector<192x32xf32>, vector<8x32xf32> -> vector<8x32xf32>
    %c0_3 = arith.constant 0 : index
    %c0_4 = arith.constant 0 : index
    %3 = vector.load %arg4[%c0_3, %c0_4] : memref<96x128xf32, #tpu.memory_space<vmem>>, vector<8x32xf32>
    %4 = arith.addf %2, %3 : vector<8x32xf32>
    %c8 = arith.constant 8 : index
    %c0_5 = arith.constant 0 : index
    %5 = vector.load %arg4[%c8, %c0_5] : memref<96x128xf32, #tpu.memory_space<vmem>>, vector<32x8xf32>
    %c72 = arith.constant 72 : index
    %c0_6 = arith.constant 0 : index
    %6 = vector.load %arg4[%c72, %c0_6] : memref<96x128xf32, #tpu.memory_space<vmem>>, vector<8x128xf32>
    %c0_7 = arith.constant 0 : index
    %c0_8 = arith.constant 0 : index
    %7 = vector.load %arg2[%c0_7, %c0_8] : memref<96x96xf32, #tpu.memory_space<vmem>>, vector<32x96xf32>
    %c192 = arith.constant 192 : index
    %c0_9 = arith.constant 0 : index
    %8 = vector.load %arg1[%c192, %c0_9] : memref<672x32xf32, #tpu.memory_space<vmem>>, vector<32x32xf32>
    %c0_10 = arith.constant 0 : index
    %c0_11 = arith.constant 0 : index
    %9 = vector.load %arg3[%c0_10, %c0_11] : memref<160x128xf32, #tpu.memory_space<vmem>>, vector<32x128xf32>
    %c224 = arith.constant 224 : index
    %c0_12 = arith.constant 0 : index
    %10 = vector.load %arg1[%c224, %c0_12] : memref<672x32xf32, #tpu.memory_space<vmem>>, vector<128x32xf32>
    %11 = vector.extract_strided_slice %6 {offsets = [0, 0], sizes = [1, 32], strides = [1, 1]} : vector<8x128xf32> to vector<1x32xf32>
    %12 = vector.extract_strided_slice %6 {offsets = [1, 0], sizes = [1, 32], strides = [1, 1]} : vector<8x128xf32> to vector<1x32xf32>
    %13 = vector.extract_strided_slice %6 {offsets = [2, 0], sizes = [1, 96], strides = [1, 1]} : vector<8x128xf32> to vector<1x96xf32>
    %14 = vector.extract_strided_slice %6 {offsets = [3, 0], sizes = [1, 32], strides = [1, 1]} : vector<8x128xf32> to vector<1x32xf32>
    %15 = vector.extract_strided_slice %6 {offsets = [4, 0], sizes = [1, 32], strides = [1, 1]} : vector<8x128xf32> to vector<1x32xf32>
    %16 = vector.extract_strided_slice %6 {offsets = [5, 0], sizes = [1, 32], strides = [1, 1]} : vector<8x128xf32> to vector<1x32xf32>
    %17 = vector.extract_strided_slice %6 {offsets = [6, 0], sizes = [1, 128], strides = [1, 1]} : vector<8x128xf32> to vector<1x128xf32>
    %18 = vector.extract_strided_slice %6 {offsets = [7, 0], sizes = [1, 32], strides = [1, 1]} : vector<8x128xf32> to vector<1x32xf32>
    %cst_13 = arith.constant dense<0.000000e+00> : vector<8xf32>
    %19 = vector.multi_reduction <add>, %4, %cst_13 [1] : vector<8x32xf32> to vector<8xf32>
    %20 = vector.shape_cast %19 : vector<8xf32> to vector<8x1xf32>
    %cst_14 = arith.constant 3.200000e+01 : f32
    %21 = vector.broadcast %cst_14 : f32 to vector<8x1xf32>
    %22 = arith.divf %20, %21 : vector<8x1xf32>
    %23 = vector.broadcast %22 : vector<8x1xf32> to vector<8x32xf32>
    %24 = arith.subf %4, %23 : vector<8x32xf32>
    %25 = arith.mulf %24, %24 : vector<8x32xf32>
    %cst_15 = arith.constant dense<0.000000e+00> : vector<8xf32>
    %26 = vector.multi_reduction <add>, %25, %cst_15 [1] : vector<8x32xf32> to vector<8xf32>
    %27 = vector.shape_cast %26 : vector<8xf32> to vector<8x1xf32>
    %cst_16 = arith.constant 3.200000e+01 : f32
    %28 = vector.broadcast %cst_16 : f32 to vector<8x1xf32>
    %29 = arith.divf %27, %28 : vector<8x1xf32>
    %30 = vector.broadcast %22 : vector<8x1xf32> to vector<8x32xf32>
    %31 = arith.subf %4, %30 : vector<8x32xf32>
    %cst_17 = arith.constant 9.99999974E-6 : f32
    %32 = vector.broadcast %cst_17 : f32 to vector<8x1xf32>
    %33 = arith.addf %29, %32 : vector<8x1xf32>
    %34 = math.rsqrt %33 : vector<8x1xf32>
    %35 = vector.broadcast %34 : vector<8x1xf32> to vector<8x32xf32>
    %36 = arith.mulf %31, %35 : vector<8x32xf32>
    %37 = vector.broadcast %11 : vector<1x32xf32> to vector<8x32xf32>
    %38 = arith.mulf %36, %37 : vector<8x32xf32>
    %39 = vector.broadcast %12 : vector<1x32xf32> to vector<8x32xf32>
    %40 = arith.addf %38, %39 : vector<8x32xf32>
    %cst_18 = arith.constant dense<0.000000e+00> : vector<8x96xf32>
    %41 = tpu.matmul %40, %7, %cst_18 {dimension_numbers = #tpu.dot_dimension_numbers<[1], [0], [0], [1], [0, 0, 1, 1], [], []>} : vector<8x32xf32>, vector<32x96xf32>, vector<8x96xf32> -> vector<8x96xf32>
    %42 = vector.broadcast %13 : vector<1x96xf32> to vector<8x96xf32>
    %43 = arith.addf %41, %42 : vector<8x96xf32>
    %44 = vector.extract_strided_slice %43 {offsets = [0, 0], sizes = [8, 32], strides = [1, 1]} : vector<8x96xf32> to vector<8x32xf32>
    %45 = vector.extract_strided_slice %43 {offsets = [0, 32], sizes = [8, 32], strides = [1, 1]} : vector<8x96xf32> to vector<8x32xf32>
    %46 = vector.extract_strided_slice %43 {offsets = [0, 64], sizes = [8, 32], strides = [1, 1]} : vector<8x96xf32> to vector<8x32xf32>
    %47 = vector.extract_strided_slice %44 {offsets = [0, 0], sizes = [8, 8], strides = [1, 1]} : vector<8x32xf32> to vector<8x8xf32>
    %48 = vector.extract_strided_slice %45 {offsets = [0, 0], sizes = [8, 8], strides = [1, 1]} : vector<8x32xf32> to vector<8x8xf32>
    %cst_19 = arith.constant dense<0.000000e+00> : vector<8x8xf32>
    %49 = tpu.matmul %47, %48, %cst_19 {dimension_numbers = #tpu.dot_dimension_numbers<[1], [1], [0], [0], [0, 0, 1, 0], [], []>} : vector<8x8xf32>, vector<8x8xf32>, vector<8x8xf32> -> vector<8x8xf32>
    %50 = vector.extract_strided_slice %44 {offsets = [0, 8], sizes = [8, 8], strides = [1, 1]} : vector<8x32xf32> to vector<8x8xf32>
    %51 = vector.extract_strided_slice %45 {offsets = [0, 8], sizes = [8, 8], strides = [1, 1]} : vector<8x32xf32> to vector<8x8xf32>
    %cst_20 = arith.constant dense<0.000000e+00> : vector<8x8xf32>
    %52 = tpu.matmul %50, %51, %cst_20 {dimension_numbers = #tpu.dot_dimension_numbers<[1], [1], [0], [0], [0, 0, 1, 0], [], []>} : vector<8x8xf32>, vector<8x8xf32>, vector<8x8xf32> -> vector<8x8xf32>
    %53 = vector.extract_strided_slice %44 {offsets = [0, 16], sizes = [8, 8], strides = [1, 1]} : vector<8x32xf32> to vector<8x8xf32>
    %54 = vector.extract_strided_slice %45 {offsets = [0, 16], sizes = [8, 8], strides = [1, 1]} : vector<8x32xf32> to vector<8x8xf32>
    %cst_21 = arith.constant dense<0.000000e+00> : vector<8x8xf32>
    %55 = tpu.matmul %53, %54, %cst_21 {dimension_numbers = #tpu.dot_dimension_numbers<[1], [1], [0], [0], [0, 0, 1, 0], [], []>} : vector<8x8xf32>, vector<8x8xf32>, vector<8x8xf32> -> vector<8x8xf32>
    %56 = vector.extract_strided_slice %44 {offsets = [0, 24], sizes = [8, 8], strides = [1, 1]} : vector<8x32xf32> to vector<8x8xf32>
    %57 = vector.extract_strided_slice %45 {offsets = [0, 24], sizes = [8, 8], strides = [1, 1]} : vector<8x32xf32> to vector<8x8xf32>
    %cst_22 = arith.constant dense<0.000000e+00> : vector<8x8xf32>
    %58 = tpu.matmul %56, %57, %cst_22 {dimension_numbers = #tpu.dot_dimension_numbers<[1], [1], [0], [0], [0, 0, 1, 0], [], []>} : vector<8x8xf32>, vector<8x8xf32>, vector<8x8xf32> -> vector<8x8xf32>
    %59 = tpu.concatenate %49, %52, %55, %58 in 0 : vector<8x8xf32>, vector<8x8xf32>, vector<8x8xf32>, vector<8x8xf32> -> vector<32x8xf32>
    %60 = arith.addf %59, %5 : vector<32x8xf32>
    %cst_23 = arith.constant dense<0xFF800000> : vector<32xf32>
    %61 = vector.multi_reduction <maximumf>, %60, %cst_23 [1] : vector<32x8xf32> to vector<32xf32>
    %62 = vector.shape_cast %61 : vector<32xf32> to vector<32x1xf32>
    %63 = vector.broadcast %62 : vector<32x1xf32> to vector<32x8xf32>
    %64 = arith.subf %60, %63 : vector<32x8xf32>
    %65 = math.exp %64 : vector<32x8xf32>
    %cst_24 = arith.constant dense<0.000000e+00> : vector<32xf32>
    %66 = vector.multi_reduction <add>, %65, %cst_24 [1] : vector<32x8xf32> to vector<32xf32>
    %67 = vector.shape_cast %66 : vector<32xf32> to vector<32x1xf32>
    %68 = tpu.reciprocal %67 {approx = true} : vector<32x1xf32> -> vector<32x1xf32>
    %69 = vector.broadcast %68 : vector<32x1xf32> to vector<32x8xf32>
    %70 = arith.mulf %65, %69 : vector<32x8xf32>
    %71 = vector.extract_strided_slice %70 {offsets = [0, 0], sizes = [8, 8], strides = [1, 1]} : vector<32x8xf32> to vector<8x8xf32>
    %72 = vector.extract_strided_slice %46 {offsets = [0, 0], sizes = [8, 8], strides = [1, 1]} : vector<8x32xf32> to vector<8x8xf32>
    %cst_25 = arith.constant dense<0.000000e+00> : vector<8x8xf32>
    %73 = tpu.matmul %71, %72, %cst_25 {dimension_numbers = #tpu.dot_dimension_numbers<[1], [0], [0], [1], [0, 0, 1, 1], [], []>} : vector<8x8xf32>, vector<8x8xf32>, vector<8x8xf32> -> vector<8x8xf32>
    %74 = vector.extract_strided_slice %70 {offsets = [8, 0], sizes = [8, 8], strides = [1, 1]} : vector<32x8xf32> to vector<8x8xf32>
    %75 = vector.extract_strided_slice %46 {offsets = [0, 8], sizes = [8, 8], strides = [1, 1]} : vector<8x32xf32> to vector<8x8xf32>
    %cst_26 = arith.constant dense<0.000000e+00> : vector<8x8xf32>
    %76 = tpu.matmul %74, %75, %cst_26 {dimension_numbers = #tpu.dot_dimension_numbers<[1], [0], [0], [1], [0, 0, 1, 1], [], []>} : vector<8x8xf32>, vector<8x8xf32>, vector<8x8xf32> -> vector<8x8xf32>
    %77 = vector.extract_strided_slice %70 {offsets = [16, 0], sizes = [8, 8], strides = [1, 1]} : vector<32x8xf32> to vector<8x8xf32>
    %78 = vector.extract_strided_slice %46 {offsets = [0, 16], sizes = [8, 8], strides = [1, 1]} : vector<8x32xf32> to vector<8x8xf32>
    %cst_27 = arith.constant dense<0.000000e+00> : vector<8x8xf32>
    %79 = tpu.matmul %77, %78, %cst_27 {dimension_numbers = #tpu.dot_dimension_numbers<[1], [0], [0], [1], [0, 0, 1, 1], [], []>} : vector<8x8xf32>, vector<8x8xf32>, vector<8x8xf32> -> vector<8x8xf32>
    %80 = vector.extract_strided_slice %70 {offsets = [24, 0], sizes = [8, 8], strides = [1, 1]} : vector<32x8xf32> to vector<8x8xf32>
    %81 = vector.extract_strided_slice %46 {offsets = [0, 24], sizes = [8, 8], strides = [1, 1]} : vector<8x32xf32> to vector<8x8xf32>
    %cst_28 = arith.constant dense<0.000000e+00> : vector<8x8xf32>
    %82 = tpu.matmul %80, %81, %cst_28 {dimension_numbers = #tpu.dot_dimension_numbers<[1], [0], [0], [1], [0, 0, 1, 1], [], []>} : vector<8x8xf32>, vector<8x8xf32>, vector<8x8xf32> -> vector<8x8xf32>
    %83 = tpu.concatenate %73, %76, %79, %82 in 1 : vector<8x8xf32>, vector<8x8xf32>, vector<8x8xf32>, vector<8x8xf32> -> vector<8x32xf32>
    %cst_29 = arith.constant dense<0.000000e+00> : vector<8x32xf32>
    %84 = tpu.matmul %83, %8, %cst_29 {dimension_numbers = #tpu.dot_dimension_numbers<[1], [0], [0], [1], [0, 0, 1, 1], [], []>} : vector<8x32xf32>, vector<32x32xf32>, vector<8x32xf32> -> vector<8x32xf32>
    %85 = vector.broadcast %14 : vector<1x32xf32> to vector<8x32xf32>
    %86 = arith.addf %84, %85 : vector<8x32xf32>
    %87 = arith.addf %4, %86 : vector<8x32xf32>
    %cst_30 = arith.constant dense<0.000000e+00> : vector<8xf32>
    %88 = vector.multi_reduction <add>, %87, %cst_30 [1] : vector<8x32xf32> to vector<8xf32>
    %89 = vector.shape_cast %88 : vector<8xf32> to vector<8x1xf32>
    %cst_31 = arith.constant 3.200000e+01 : f32
    %90 = vector.broadcast %cst_31 : f32 to vector<8x1xf32>
    %91 = arith.divf %89, %90 : vector<8x1xf32>
    %92 = vector.broadcast %91 : vector<8x1xf32> to vector<8x32xf32>
    %93 = arith.subf %87, %92 : vector<8x32xf32>
    %94 = arith.mulf %93, %93 : vector<8x32xf32>
    %cst_32 = arith.constant dense<0.000000e+00> : vector<8xf32>
    %95 = vector.multi_reduction <add>, %94, %cst_32 [1] : vector<8x32xf32> to vector<8xf32>
    %96 = vector.shape_cast %95 : vector<8xf32> to vector<8x1xf32>
    %cst_33 = arith.constant 3.200000e+01 : f32
    %97 = vector.broadcast %cst_33 : f32 to vector<8x1xf32>
    %98 = arith.divf %96, %97 : vector<8x1xf32>
    %99 = vector.broadcast %91 : vector<8x1xf32> to vector<8x32xf32>
    %100 = arith.subf %87, %99 : vector<8x32xf32>
    %cst_34 = arith.constant 9.99999974E-6 : f32
    %101 = vector.broadcast %cst_34 : f32 to vector<8x1xf32>
    %102 = arith.addf %98, %101 : vector<8x1xf32>
    %103 = math.rsqrt %102 : vector<8x1xf32>
    %104 = vector.broadcast %103 : vector<8x1xf32> to vector<8x32xf32>
    %105 = arith.mulf %100, %104 : vector<8x32xf32>
    %106 = vector.broadcast %15 : vector<1x32xf32> to vector<8x32xf32>
    %107 = arith.mulf %105, %106 : vector<8x32xf32>
    %108 = vector.broadcast %16 : vector<1x32xf32> to vector<8x32xf32>
    %109 = arith.addf %107, %108 : vector<8x32xf32>
    %cst_35 = arith.constant dense<0.000000e+00> : vector<8x128xf32>
    %110 = tpu.matmul %109, %9, %cst_35 {dimension_numbers = #tpu.dot_dimension_numbers<[1], [0], [0], [1], [0, 0, 1, 1], [], []>} : vector<8x32xf32>, vector<32x128xf32>, vector<8x128xf32> -> vector<8x128xf32>
    %111 = vector.broadcast %17 : vector<1x128xf32> to vector<8x128xf32>
    %112 = arith.addf %110, %111 : vector<8x128xf32>
    %113 = arith.mulf %112, %112 : vector<8x128xf32>
    %114 = arith.mulf %112, %113 : vector<8x128xf32>
    %cst_36 = arith.constant 4.471500e-02 : f32
    %115 = vector.broadcast %cst_36 : f32 to vector<8x128xf32>
    %116 = arith.mulf %115, %114 : vector<8x128xf32>
    %117 = arith.addf %112, %116 : vector<8x128xf32>
    %cst_37 = arith.constant 0.797884583 : f32
    %118 = vector.broadcast %cst_37 : f32 to vector<8x128xf32>
    %119 = arith.mulf %118, %117 : vector<8x128xf32>
    %120 = math.tanh %119 : vector<8x128xf32>
    %cst_38 = arith.constant 1.000000e+00 : f32
    %121 = vector.broadcast %cst_38 : f32 to vector<8x128xf32>
    %122 = arith.addf %121, %120 : vector<8x128xf32>
    %cst_39 = arith.constant 5.000000e-01 : f32
    %123 = vector.broadcast %cst_39 : f32 to vector<8x128xf32>
    %124 = arith.mulf %123, %122 : vector<8x128xf32>
    %125 = arith.mulf %112, %124 : vector<8x128xf32>
    %cst_40 = arith.constant dense<0.000000e+00> : vector<8x32xf32>
    %126 = tpu.matmul %125, %10, %cst_40 {dimension_numbers = #tpu.dot_dimension_numbers<[1], [0], [0], [1], [0, 0, 1, 1], [], []>} : vector<8x128xf32>, vector<128x32xf32>, vector<8x32xf32> -> vector<8x32xf32>
    %127 = arith.addf %87, %126 : vector<8x32xf32>
    %128 = vector.broadcast %18 : vector<1x32xf32> to vector<8x32xf32>
    %129 = arith.addf %127, %128 : vector<8x32xf32>
    %c80 = arith.constant 80 : index
    %c0_41 = arith.constant 0 : index
    %130 = vector.load %arg4[%c80, %c0_41] : memref<96x128xf32, #tpu.memory_space<vmem>>, vector<8x128xf32>
    %c32 = arith.constant 32 : index
    %c0_42 = arith.constant 0 : index
    %131 = vector.load %arg2[%c32, %c0_42] : memref<96x96xf32, #tpu.memory_space<vmem>>, vector<32x96xf32>
    %c352 = arith.constant 352 : index
    %c0_43 = arith.constant 0 : index
    %132 = vector.load %arg1[%c352, %c0_43] : memref<672x32xf32, #tpu.memory_space<vmem>>, vector<32x32xf32>
    %c32_44 = arith.constant 32 : index
    %c0_45 = arith.constant 0 : index
    %133 = vector.load %arg3[%c32_44, %c0_45] : memref<160x128xf32, #tpu.memory_space<vmem>>, vector<32x128xf32>
    %c384 = arith.constant 384 : index
    %c0_46 = arith.constant 0 : index
    %134 = vector.load %arg1[%c384, %c0_46] : memref<672x32xf32, #tpu.memory_space<vmem>>, vector<128x32xf32>
    %135 = vector.extract_strided_slice %130 {offsets = [0, 0], sizes = [1, 32], strides = [1, 1]} : vector<8x128xf32> to vector<1x32xf32>
    %136 = vector.extract_strided_slice %130 {offsets = [1, 0], sizes = [1, 32], strides = [1, 1]} : vector<8x128xf32> to vector<1x32xf32>
    %137 = vector.extract_strided_slice %130 {offsets = [2, 0], sizes = [1, 96], strides = [1, 1]} : vector<8x128xf32> to vector<1x96xf32>
    %138 = vector.extract_strided_slice %130 {offsets = [3, 0], sizes = [1, 32], strides = [1, 1]} : vector<8x128xf32> to vector<1x32xf32>
    %139 = vector.extract_strided_slice %130 {offsets = [4, 0], sizes = [1, 32], strides = [1, 1]} : vector<8x128xf32> to vector<1x32xf32>
    %140 = vector.extract_strided_slice %130 {offsets = [5, 0], sizes = [1, 32], strides = [1, 1]} : vector<8x128xf32> to vector<1x32xf32>
    %141 = vector.extract_strided_slice %130 {offsets = [6, 0], sizes = [1, 128], strides = [1, 1]} : vector<8x128xf32> to vector<1x128xf32>
    %142 = vector.extract_strided_slice %130 {offsets = [7, 0], sizes = [1, 32], strides = [1, 1]} : vector<8x128xf32> to vector<1x32xf32>
    %cst_47 = arith.constant dense<0.000000e+00> : vector<8xf32>
    %143 = vector.multi_reduction <add>, %129, %cst_47 [1] : vector<8x32xf32> to vector<8xf32>
    %144 = vector.shape_cast %143 : vector<8xf32> to vector<8x1xf32>
    %cst_48 = arith.constant 3.200000e+01 : f32
    %145 = vector.broadcast %cst_48 : f32 to vector<8x1xf32>
    %146 = arith.divf %144, %145 : vector<8x1xf32>
    %147 = vector.broadcast %146 : vector<8x1xf32> to vector<8x32xf32>
    %148 = arith.subf %129, %147 : vector<8x32xf32>
    %149 = arith.mulf %148, %148 : vector<8x32xf32>
    %cst_49 = arith.constant dense<0.000000e+00> : vector<8xf32>
    %150 = vector.multi_reduction <add>, %149, %cst_49 [1] : vector<8x32xf32> to vector<8xf32>
    %151 = vector.shape_cast %150 : vector<8xf32> to vector<8x1xf32>
    %cst_50 = arith.constant 3.200000e+01 : f32
    %152 = vector.broadcast %cst_50 : f32 to vector<8x1xf32>
    %153 = arith.divf %151, %152 : vector<8x1xf32>
    %154 = vector.broadcast %146 : vector<8x1xf32> to vector<8x32xf32>
    %155 = arith.subf %129, %154 : vector<8x32xf32>
    %cst_51 = arith.constant 9.99999974E-6 : f32
    %156 = vector.broadcast %cst_51 : f32 to vector<8x1xf32>
    %157 = arith.addf %153, %156 : vector<8x1xf32>
    %158 = math.rsqrt %157 : vector<8x1xf32>
    %159 = vector.broadcast %158 : vector<8x1xf32> to vector<8x32xf32>
    %160 = arith.mulf %155, %159 : vector<8x32xf32>
    %161 = vector.broadcast %135 : vector<1x32xf32> to vector<8x32xf32>
    %162 = arith.mulf %160, %161 : vector<8x32xf32>
    %163 = vector.broadcast %136 : vector<1x32xf32> to vector<8x32xf32>
    %164 = arith.addf %162, %163 : vector<8x32xf32>
    %cst_52 = arith.constant dense<0.000000e+00> : vector<8x96xf32>
    %165 = tpu.matmul %164, %131, %cst_52 {dimension_numbers = #tpu.dot_dimension_numbers<[1], [0], [0], [1], [0, 0, 1, 1], [], []>} : vector<8x32xf32>, vector<32x96xf32>, vector<8x96xf32> -> vector<8x96xf32>
    %166 = vector.broadcast %137 : vector<1x96xf32> to vector<8x96xf32>
    %167 = arith.addf %165, %166 : vector<8x96xf32>
    %168 = vector.extract_strided_slice %167 {offsets = [0, 0], sizes = [8, 32], strides = [1, 1]} : vector<8x96xf32> to vector<8x32xf32>
    %169 = vector.extract_strided_slice %167 {offsets = [0, 32], sizes = [8, 32], strides = [1, 1]} : vector<8x96xf32> to vector<8x32xf32>
    %170 = vector.extract_strided_slice %167 {offsets = [0, 64], sizes = [8, 32], strides = [1, 1]} : vector<8x96xf32> to vector<8x32xf32>
    %171 = vector.extract_strided_slice %168 {offsets = [0, 0], sizes = [8, 8], strides = [1, 1]} : vector<8x32xf32> to vector<8x8xf32>
    %172 = vector.extract_strided_slice %169 {offsets = [0, 0], sizes = [8, 8], strides = [1, 1]} : vector<8x32xf32> to vector<8x8xf32>
    %cst_53 = arith.constant dense<0.000000e+00> : vector<8x8xf32>
    %173 = tpu.matmul %171, %172, %cst_53 {dimension_numbers = #tpu.dot_dimension_numbers<[1], [1], [0], [0], [0, 0, 1, 0], [], []>} : vector<8x8xf32>, vector<8x8xf32>, vector<8x8xf32> -> vector<8x8xf32>
    %174 = vector.extract_strided_slice %168 {offsets = [0, 8], sizes = [8, 8], strides = [1, 1]} : vector<8x32xf32> to vector<8x8xf32>
    %175 = vector.extract_strided_slice %169 {offsets = [0, 8], sizes = [8, 8], strides = [1, 1]} : vector<8x32xf32> to vector<8x8xf32>
    %cst_54 = arith.constant dense<0.000000e+00> : vector<8x8xf32>
    %176 = tpu.matmul %174, %175, %cst_54 {dimension_numbers = #tpu.dot_dimension_numbers<[1], [1], [0], [0], [0, 0, 1, 0], [], []>} : vector<8x8xf32>, vector<8x8xf32>, vector<8x8xf32> -> vector<8x8xf32>
    %177 = vector.extract_strided_slice %168 {offsets = [0, 16], sizes = [8, 8], strides = [1, 1]} : vector<8x32xf32> to vector<8x8xf32>
    %178 = vector.extract_strided_slice %169 {offsets = [0, 16], sizes = [8, 8], strides = [1, 1]} : vector<8x32xf32> to vector<8x8xf32>
    %cst_55 = arith.constant dense<0.000000e+00> : vector<8x8xf32>
    %179 = tpu.matmul %177, %178, %cst_55 {dimension_numbers = #tpu.dot_dimension_numbers<[1], [1], [0], [0], [0, 0, 1, 0], [], []>} : vector<8x8xf32>, vector<8x8xf32>, vector<8x8xf32> -> vector<8x8xf32>
    %180 = vector.extract_strided_slice %168 {offsets = [0, 24], sizes = [8, 8], strides = [1, 1]} : vector<8x32xf32> to vector<8x8xf32>
    %181 = vector.extract_strided_slice %169 {offsets = [0, 24], sizes = [8, 8], strides = [1, 1]} : vector<8x32xf32> to vector<8x8xf32>
    %cst_56 = arith.constant dense<0.000000e+00> : vector<8x8xf32>
    %182 = tpu.matmul %180, %181, %cst_56 {dimension_numbers = #tpu.dot_dimension_numbers<[1], [1], [0], [0], [0, 0, 1, 0], [], []>} : vector<8x8xf32>, vector<8x8xf32>, vector<8x8xf32> -> vector<8x8xf32>
    %183 = tpu.concatenate %173, %176, %179, %182 in 0 : vector<8x8xf32>, vector<8x8xf32>, vector<8x8xf32>, vector<8x8xf32> -> vector<32x8xf32>
    %184 = arith.addf %183, %5 : vector<32x8xf32>
    %cst_57 = arith.constant dense<0xFF800000> : vector<32xf32>
    %185 = vector.multi_reduction <maximumf>, %184, %cst_57 [1] : vector<32x8xf32> to vector<32xf32>
    %186 = vector.shape_cast %185 : vector<32xf32> to vector<32x1xf32>
    %187 = vector.broadcast %186 : vector<32x1xf32> to vector<32x8xf32>
    %188 = arith.subf %184, %187 : vector<32x8xf32>
    %189 = math.exp %188 : vector<32x8xf32>
    %cst_58 = arith.constant dense<0.000000e+00> : vector<32xf32>
    %190 = vector.multi_reduction <add>, %189, %cst_58 [1] : vector<32x8xf32> to vector<32xf32>
    %191 = vector.shape_cast %190 : vector<32xf32> to vector<32x1xf32>
    %192 = tpu.reciprocal %191 {approx = true} : vector<32x1xf32> -> vector<32x1xf32>
    %193 = vector.broadcast %192 : vector<32x1xf32> to vector<32x8xf32>
    %194 = arith.mulf %189, %193 : vector<32x8xf32>
    %195 = vector.extract_strided_slice %194 {offsets = [0, 0], sizes = [8, 8], strides = [1, 1]} : vector<32x8xf32> to vector<8x8xf32>
    %196 = vector.extract_strided_slice %170 {offsets = [0, 0], sizes = [8, 8], strides = [1, 1]} : vector<8x32xf32> to vector<8x8xf32>
    %cst_59 = arith.constant dense<0.000000e+00> : vector<8x8xf32>
    %197 = tpu.matmul %195, %196, %cst_59 {dimension_numbers = #tpu.dot_dimension_numbers<[1], [0], [0], [1], [0, 0, 1, 1], [], []>} : vector<8x8xf32>, vector<8x8xf32>, vector<8x8xf32> -> vector<8x8xf32>
    %198 = vector.extract_strided_slice %194 {offsets = [8, 0], sizes = [8, 8], strides = [1, 1]} : vector<32x8xf32> to vector<8x8xf32>
    %199 = vector.extract_strided_slice %170 {offsets = [0, 8], sizes = [8, 8], strides = [1, 1]} : vector<8x32xf32> to vector<8x8xf32>
    %cst_60 = arith.constant dense<0.000000e+00> : vector<8x8xf32>
    %200 = tpu.matmul %198, %199, %cst_60 {dimension_numbers = #tpu.dot_dimension_numbers<[1], [0], [0], [1], [0, 0, 1, 1], [], []>} : vector<8x8xf32>, vector<8x8xf32>, vector<8x8xf32> -> vector<8x8xf32>
    %201 = vector.extract_strided_slice %194 {offsets = [16, 0], sizes = [8, 8], strides = [1, 1]} : vector<32x8xf32> to vector<8x8xf32>
    %202 = vector.extract_strided_slice %170 {offsets = [0, 16], sizes = [8, 8], strides = [1, 1]} : vector<8x32xf32> to vector<8x8xf32>
    %cst_61 = arith.constant dense<0.000000e+00> : vector<8x8xf32>
    %203 = tpu.matmul %201, %202, %cst_61 {dimension_numbers = #tpu.dot_dimension_numbers<[1], [0], [0], [1], [0, 0, 1, 1], [], []>} : vector<8x8xf32>, vector<8x8xf32>, vector<8x8xf32> -> vector<8x8xf32>
    %204 = vector.extract_strided_slice %194 {offsets = [24, 0], sizes = [8, 8], strides = [1, 1]} : vector<32x8xf32> to vector<8x8xf32>
    %205 = vector.extract_strided_slice %170 {offsets = [0, 24], sizes = [8, 8], strides = [1, 1]} : vector<8x32xf32> to vector<8x8xf32>
    %cst_62 = arith.constant dense<0.000000e+00> : vector<8x8xf32>
    %206 = tpu.matmul %204, %205, %cst_62 {dimension_numbers = #tpu.dot_dimension_numbers<[1], [0], [0], [1], [0, 0, 1, 1], [], []>} : vector<8x8xf32>, vector<8x8xf32>, vector<8x8xf32> -> vector<8x8xf32>
    %207 = tpu.concatenate %197, %200, %203, %206 in 1 : vector<8x8xf32>, vector<8x8xf32>, vector<8x8xf32>, vector<8x8xf32> -> vector<8x32xf32>
    %cst_63 = arith.constant dense<0.000000e+00> : vector<8x32xf32>
    %208 = tpu.matmul %207, %132, %cst_63 {dimension_numbers = #tpu.dot_dimension_numbers<[1], [0], [0], [1], [0, 0, 1, 1], [], []>} : vector<8x32xf32>, vector<32x32xf32>, vector<8x32xf32> -> vector<8x32xf32>
    %209 = vector.broadcast %138 : vector<1x32xf32> to vector<8x32xf32>
    %210 = arith.addf %208, %209 : vector<8x32xf32>
    %211 = arith.addf %129, %210 : vector<8x32xf32>
    %cst_64 = arith.constant dense<0.000000e+00> : vector<8xf32>
    %212 = vector.multi_reduction <add>, %211, %cst_64 [1] : vector<8x32xf32> to vector<8xf32>
    %213 = vector.shape_cast %212 : vector<8xf32> to vector<8x1xf32>
    %cst_65 = arith.constant 3.200000e+01 : f32
    %214 = vector.broadcast %cst_65 : f32 to vector<8x1xf32>
    %215 = arith.divf %213, %214 : vector<8x1xf32>
    %216 = vector.broadcast %215 : vector<8x1xf32> to vector<8x32xf32>
    %217 = arith.subf %211, %216 : vector<8x32xf32>
    %218 = arith.mulf %217, %217 : vector<8x32xf32>
    %cst_66 = arith.constant dense<0.000000e+00> : vector<8xf32>
    %219 = vector.multi_reduction <add>, %218, %cst_66 [1] : vector<8x32xf32> to vector<8xf32>
    %220 = vector.shape_cast %219 : vector<8xf32> to vector<8x1xf32>
    %cst_67 = arith.constant 3.200000e+01 : f32
    %221 = vector.broadcast %cst_67 : f32 to vector<8x1xf32>
    %222 = arith.divf %220, %221 : vector<8x1xf32>
    %223 = vector.broadcast %215 : vector<8x1xf32> to vector<8x32xf32>
    %224 = arith.subf %211, %223 : vector<8x32xf32>
    %cst_68 = arith.constant 9.99999974E-6 : f32
    %225 = vector.broadcast %cst_68 : f32 to vector<8x1xf32>
    %226 = arith.addf %222, %225 : vector<8x1xf32>
    %227 = math.rsqrt %226 : vector<8x1xf32>
    %228 = vector.broadcast %227 : vector<8x1xf32> to vector<8x32xf32>
    %229 = arith.mulf %224, %228 : vector<8x32xf32>
    %230 = vector.broadcast %139 : vector<1x32xf32> to vector<8x32xf32>
    %231 = arith.mulf %229, %230 : vector<8x32xf32>
    %232 = vector.broadcast %140 : vector<1x32xf32> to vector<8x32xf32>
    %233 = arith.addf %231, %232 : vector<8x32xf32>
    %cst_69 = arith.constant dense<0.000000e+00> : vector<8x128xf32>
    %234 = tpu.matmul %233, %133, %cst_69 {dimension_numbers = #tpu.dot_dimension_numbers<[1], [0], [0], [1], [0, 0, 1, 1], [], []>} : vector<8x32xf32>, vector<32x128xf32>, vector<8x128xf32> -> vector<8x128xf32>
    %235 = vector.broadcast %141 : vector<1x128xf32> to vector<8x128xf32>
    %236 = arith.addf %234, %235 : vector<8x128xf32>
    %237 = arith.mulf %236, %236 : vector<8x128xf32>
    %238 = arith.mulf %236, %237 : vector<8x128xf32>
    %cst_70 = arith.constant 4.471500e-02 : f32
    %239 = vector.broadcast %cst_70 : f32 to vector<8x128xf32>
    %240 = arith.mulf %239, %238 : vector<8x128xf32>
    %241 = arith.addf %236, %240 : vector<8x128xf32>
    %cst_71 = arith.constant 0.797884583 : f32
    %242 = vector.broadcast %cst_71 : f32 to vector<8x128xf32>
    %243 = arith.mulf %242, %241 : vector<8x128xf32>
    %244 = math.tanh %243 : vector<8x128xf32>
    %cst_72 = arith.constant 1.000000e+00 : f32
    %245 = vector.broadcast %cst_72 : f32 to vector<8x128xf32>
    %246 = arith.addf %245, %244 : vector<8x128xf32>
    %cst_73 = arith.constant 5.000000e-01 : f32
    %247 = vector.broadcast %cst_73 : f32 to vector<8x128xf32>
    %248 = arith.mulf %247, %246 : vector<8x128xf32>
    %249 = arith.mulf %236, %248 : vector<8x128xf32>
    %cst_74 = arith.constant dense<0.000000e+00> : vector<8x32xf32>
    %250 = tpu.matmul %249, %134, %cst_74 {dimension_numbers = #tpu.dot_dimension_numbers<[1], [0], [0], [1], [0, 0, 1, 1], [], []>} : vector<8x128xf32>, vector<128x32xf32>, vector<8x32xf32> -> vector<8x32xf32>
    %251 = arith.addf %211, %250 : vector<8x32xf32>
    %252 = vector.broadcast %142 : vector<1x32xf32> to vector<8x32xf32>
    %253 = arith.addf %251, %252 : vector<8x32xf32>
    %c88 = arith.constant 88 : index
    %c0_75 = arith.constant 0 : index
    %254 = vector.load %arg4[%c88, %c0_75] : memref<96x128xf32, #tpu.memory_space<vmem>>, vector<8x128xf32>
    %c64 = arith.constant 64 : index
    %c0_76 = arith.constant 0 : index
    %255 = vector.load %arg2[%c64, %c0_76] : memref<96x96xf32, #tpu.memory_space<vmem>>, vector<32x96xf32>
    %c512 = arith.constant 512 : index
    %c0_77 = arith.constant 0 : index
    %256 = vector.load %arg1[%c512, %c0_77] : memref<672x32xf32, #tpu.memory_space<vmem>>, vector<32x32xf32>
    %c64_78 = arith.constant 64 : index
    %c0_79 = arith.constant 0 : index
    %257 = vector.load %arg3[%c64_78, %c0_79] : memref<160x128xf32, #tpu.memory_space<vmem>>, vector<32x128xf32>
    %c544 = arith.constant 544 : index
    %c0_80 = arith.constant 0 : index
    %258 = vector.load %arg1[%c544, %c0_80] : memref<672x32xf32, #tpu.memory_space<vmem>>, vector<128x32xf32>
    %259 = vector.extract_strided_slice %254 {offsets = [0, 0], sizes = [1, 32], strides = [1, 1]} : vector<8x128xf32> to vector<1x32xf32>
    %260 = vector.extract_strided_slice %254 {offsets = [1, 0], sizes = [1, 32], strides = [1, 1]} : vector<8x128xf32> to vector<1x32xf32>
    %261 = vector.extract_strided_slice %254 {offsets = [2, 0], sizes = [1, 96], strides = [1, 1]} : vector<8x128xf32> to vector<1x96xf32>
    %262 = vector.extract_strided_slice %254 {offsets = [3, 0], sizes = [1, 32], strides = [1, 1]} : vector<8x128xf32> to vector<1x32xf32>
    %263 = vector.extract_strided_slice %254 {offsets = [4, 0], sizes = [1, 32], strides = [1, 1]} : vector<8x128xf32> to vector<1x32xf32>
    %264 = vector.extract_strided_slice %254 {offsets = [5, 0], sizes = [1, 32], strides = [1, 1]} : vector<8x128xf32> to vector<1x32xf32>
    %265 = vector.extract_strided_slice %254 {offsets = [6, 0], sizes = [1, 128], strides = [1, 1]} : vector<8x128xf32> to vector<1x128xf32>
    %266 = vector.extract_strided_slice %254 {offsets = [7, 0], sizes = [1, 32], strides = [1, 1]} : vector<8x128xf32> to vector<1x32xf32>
    %c56 = arith.constant 56 : index
    %c0_81 = arith.constant 0 : index
    %267 = vector.load %arg4[%c56, %c0_81] : memref<96x128xf32, #tpu.memory_space<vmem>>, vector<16x128xf32>
    %268 = vector.extract_strided_slice %267 {offsets = [0, 0], sizes = [4, 32], strides = [1, 1]} : vector<16x128xf32> to vector<4x32xf32>
    %cst_82 = arith.constant dense<0.000000e+00> : vector<8xf32>
    %269 = vector.multi_reduction <add>, %253, %cst_82 [1] : vector<8x32xf32> to vector<8xf32>
    %270 = vector.shape_cast %269 : vector<8xf32> to vector<8x1xf32>
    %cst_83 = arith.constant 3.200000e+01 : f32
    %271 = vector.broadcast %cst_83 : f32 to vector<8x1xf32>
    %272 = arith.divf %270, %271 : vector<8x1xf32>
    %273 = vector.broadcast %272 : vector<8x1xf32> to vector<8x32xf32>
    %274 = arith.subf %253, %273 : vector<8x32xf32>
    %275 = arith.mulf %274, %274 : vector<8x32xf32>
    %cst_84 = arith.constant dense<0.000000e+00> : vector<8xf32>
    %276 = vector.multi_reduction <add>, %275, %cst_84 [1] : vector<8x32xf32> to vector<8xf32>
    %277 = vector.shape_cast %276 : vector<8xf32> to vector<8x1xf32>
    %cst_85 = arith.constant 3.200000e+01 : f32
    %278 = vector.broadcast %cst_85 : f32 to vector<8x1xf32>
    %279 = arith.divf %277, %278 : vector<8x1xf32>
    %280 = vector.broadcast %272 : vector<8x1xf32> to vector<8x32xf32>
    %281 = arith.subf %253, %280 : vector<8x32xf32>
    %cst_86 = arith.constant 9.99999974E-6 : f32
    %282 = vector.broadcast %cst_86 : f32 to vector<8x1xf32>
    %283 = arith.addf %279, %282 : vector<8x1xf32>
    %284 = math.rsqrt %283 : vector<8x1xf32>
    %285 = vector.broadcast %284 : vector<8x1xf32> to vector<8x32xf32>
    %286 = arith.mulf %281, %285 : vector<8x32xf32>
    %287 = vector.broadcast %259 : vector<1x32xf32> to vector<8x32xf32>
    %288 = arith.mulf %286, %287 : vector<8x32xf32>
    %289 = vector.broadcast %260 : vector<1x32xf32> to vector<8x32xf32>
    %290 = arith.addf %288, %289 : vector<8x32xf32>
    %cst_87 = arith.constant dense<0.000000e+00> : vector<8x96xf32>
    %291 = tpu.matmul %290, %255, %cst_87 {dimension_numbers = #tpu.dot_dimension_numbers<[1], [0], [0], [1], [0, 0, 1, 1], [], []>} : vector<8x32xf32>, vector<32x96xf32>, vector<8x96xf32> -> vector<8x96xf32>
    %292 = vector.broadcast %261 : vector<1x96xf32> to vector<8x96xf32>
    %293 = arith.addf %291, %292 : vector<8x96xf32>
    %cst_88 = arith.constant dense<0.000000e+00> : vector<4xf32>
    %294 = vector.multi_reduction <add>, %268, %cst_88 [1] : vector<4x32xf32> to vector<4xf32>
    %295 = vector.shape_cast %294 : vector<4xf32> to vector<4x1xf32>
    %cst_89 = arith.constant 3.200000e+01 : f32
    %296 = vector.broadcast %cst_89 : f32 to vector<4x1xf32>
    %297 = arith.divf %295, %296 : vector<4x1xf32>
    %298 = vector.broadcast %297 : vector<4x1xf32> to vector<4x32xf32>
    %299 = arith.subf %268, %298 : vector<4x32xf32>
    %300 = arith.mulf %299, %299 : vector<4x32xf32>
    %cst_90 = arith.constant dense<0.000000e+00> : vector<4xf32>
    %301 = vector.multi_reduction <add>, %300, %cst_90 [1] : vector<4x32xf32> to vector<4xf32>
    %302 = vector.shape_cast %301 : vector<4xf32> to vector<4x1xf32>
    %cst_91 = arith.constant 3.200000e+01 : f32
    %303 = vector.broadcast %cst_91 : f32 to vector<4x1xf32>
    %304 = arith.divf %302, %303 : vector<4x1xf32>
    %305 = vector.broadcast %297 : vector<4x1xf32> to vector<4x32xf32>
    %306 = arith.subf %268, %305 : vector<4x32xf32>
    %cst_92 = arith.constant 9.99999974E-6 : f32
    %307 = vector.broadcast %cst_92 : f32 to vector<4x1xf32>
    %308 = arith.addf %304, %307 : vector<4x1xf32>
    %309 = math.rsqrt %308 : vector<4x1xf32>
    %310 = vector.broadcast %309 : vector<4x1xf32> to vector<4x32xf32>
    %311 = arith.mulf %306, %310 : vector<4x32xf32>
    %312 = vector.broadcast %259 : vector<1x32xf32> to vector<4x32xf32>
    %313 = arith.mulf %311, %312 : vector<4x32xf32>
    %314 = vector.broadcast %260 : vector<1x32xf32> to vector<4x32xf32>
    %315 = arith.addf %313, %314 : vector<4x32xf32>
    %cst_93 = arith.constant dense<0.000000e+00> : vector<4x96xf32>
    %316 = tpu.matmul %315, %255, %cst_93 {dimension_numbers = #tpu.dot_dimension_numbers<[1], [0], [0], [1], [0, 0, 1, 1], [], []>} : vector<4x32xf32>, vector<32x96xf32>, vector<4x96xf32> -> vector<4x96xf32>
    %317 = vector.broadcast %261 : vector<1x96xf32> to vector<4x96xf32>
    %318 = arith.addf %316, %317 : vector<4x96xf32>
    %319 = vector.extract_strided_slice %318 {offsets = [0, 32], sizes = [4, 32], strides = [1, 1]} : vector<4x96xf32> to vector<4x32xf32>
    %320 = vector.extract_strided_slice %293 {offsets = [0, 32], sizes = [8, 32], strides = [1, 1]} : vector<8x96xf32> to vector<8x32xf32>
    %321 = tpu.concatenate %319, %320 in 0 : vector<4x32xf32>, vector<8x32xf32> -> vector<12x32xf32>
    %322 = vector.extract_strided_slice %318 {offsets = [0, 64], sizes = [4, 32], strides = [1, 1]} : vector<4x96xf32> to vector<4x32xf32>
    %323 = vector.extract_strided_slice %293 {offsets = [0, 64], sizes = [8, 32], strides = [1, 1]} : vector<8x96xf32> to vector<8x32xf32>
    %324 = tpu.concatenate %322, %323 in 0 : vector<4x32xf32>, vector<8x32xf32> -> vector<12x32xf32>
    %c40 = arith.constant 40 : index
    %c0_94 = arith.constant 0 : index
    %325 = vector.load %arg4[%c40, %c0_94] : memref<96x128xf32, #tpu.memory_space<vmem>>, vector<16x12xf32>
    %326 = vector.extract_strided_slice %318 {offsets = [0, 0], sizes = [4, 32], strides = [1, 1]} : vector<4x96xf32> to vector<4x32xf32>
    %327 = vector.extract_strided_slice %326 {offsets = [0, 0], sizes = [4, 8], strides = [1, 1]} : vector<4x32xf32> to vector<4x8xf32>
    %328 = vector.extract_strided_slice %321 {offsets = [0, 0], sizes = [12, 8], strides = [1, 1]} : vector<12x32xf32> to vector<12x8xf32>
    %cst_95 = arith.constant dense<0.000000e+00> : vector<4x12xf32>
    %329 = tpu.matmul %327, %328, %cst_95 {dimension_numbers = #tpu.dot_dimension_numbers<[1], [1], [0], [0], [0, 0, 1, 0], [], []>} : vector<4x8xf32>, vector<12x8xf32>, vector<4x12xf32> -> vector<4x12xf32>
    %330 = vector.extract_strided_slice %326 {offsets = [0, 8], sizes = [4, 8], strides = [1, 1]} : vector<4x32xf32> to vector<4x8xf32>
    %331 = vector.extract_strided_slice %321 {offsets = [0, 8], sizes = [12, 8], strides = [1, 1]} : vector<12x32xf32> to vector<12x8xf32>
    %cst_96 = arith.constant dense<0.000000e+00> : vector<4x12xf32>
    %332 = tpu.matmul %330, %331, %cst_96 {dimension_numbers = #tpu.dot_dimension_numbers<[1], [1], [0], [0], [0, 0, 1, 0], [], []>} : vector<4x8xf32>, vector<12x8xf32>, vector<4x12xf32> -> vector<4x12xf32>
    %333 = vector.extract_strided_slice %326 {offsets = [0, 16], sizes = [4, 8], strides = [1, 1]} : vector<4x32xf32> to vector<4x8xf32>
    %334 = vector.extract_strided_slice %321 {offsets = [0, 16], sizes = [12, 8], strides = [1, 1]} : vector<12x32xf32> to vector<12x8xf32>
    %cst_97 = arith.constant dense<0.000000e+00> : vector<4x12xf32>
    %335 = tpu.matmul %333, %334, %cst_97 {dimension_numbers = #tpu.dot_dimension_numbers<[1], [1], [0], [0], [0, 0, 1, 0], [], []>} : vector<4x8xf32>, vector<12x8xf32>, vector<4x12xf32> -> vector<4x12xf32>
    %336 = vector.extract_strided_slice %326 {offsets = [0, 24], sizes = [4, 8], strides = [1, 1]} : vector<4x32xf32> to vector<4x8xf32>
    %337 = vector.extract_strided_slice %321 {offsets = [0, 24], sizes = [12, 8], strides = [1, 1]} : vector<12x32xf32> to vector<12x8xf32>
    %cst_98 = arith.constant dense<0.000000e+00> : vector<4x12xf32>
    %338 = tpu.matmul %336, %337, %cst_98 {dimension_numbers = #tpu.dot_dimension_numbers<[1], [1], [0], [0], [0, 0, 1, 0], [], []>} : vector<4x8xf32>, vector<12x8xf32>, vector<4x12xf32> -> vector<4x12xf32>
    %339 = tpu.concatenate %329, %332, %335, %338 in 0 : vector<4x12xf32>, vector<4x12xf32>, vector<4x12xf32>, vector<4x12xf32> -> vector<16x12xf32>
    %340 = arith.addf %339, %325 : vector<16x12xf32>
    %cst_99 = arith.constant dense<0xFF800000> : vector<16xf32>
    %341 = vector.multi_reduction <maximumf>, %340, %cst_99 [1] : vector<16x12xf32> to vector<16xf32>
    %342 = vector.shape_cast %341 : vector<16xf32> to vector<16x1xf32>
    %343 = vector.broadcast %342 : vector<16x1xf32> to vector<16x12xf32>
    %344 = arith.subf %340, %343 : vector<16x12xf32>
    %345 = math.exp %344 : vector<16x12xf32>
    %cst_100 = arith.constant dense<0.000000e+00> : vector<16xf32>
    %346 = vector.multi_reduction <add>, %345, %cst_100 [1] : vector<16x12xf32> to vector<16xf32>
    %347 = vector.shape_cast %346 : vector<16xf32> to vector<16x1xf32>
    %348 = tpu.reciprocal %347 {approx = true} : vector<16x1xf32> -> vector<16x1xf32>
    %349 = vector.broadcast %348 : vector<16x1xf32> to vector<16x12xf32>
    %350 = arith.mulf %345, %349 : vector<16x12xf32>
    %351 = vector.extract_strided_slice %350 {offsets = [0, 0], sizes = [4, 12], strides = [1, 1]} : vector<16x12xf32> to vector<4x12xf32>
    %352 = vector.extract_strided_slice %324 {offsets = [0, 0], sizes = [12, 8], strides = [1, 1]} : vector<12x32xf32> to vector<12x8xf32>
    %cst_101 = arith.constant dense<0.000000e+00> : vector<4x8xf32>
    %353 = tpu.matmul %351, %352, %cst_101 {dimension_numbers = #tpu.dot_dimension_numbers<[1], [0], [0], [1], [0, 0, 1, 1], [], []>} : vector<4x12xf32>, vector<12x8xf32>, vector<4x8xf32> -> vector<4x8xf32>
    %354 = vector.extract_strided_slice %350 {offsets = [4, 0], sizes = [4, 12], strides = [1, 1]} : vector<16x12xf32> to vector<4x12xf32>
    %355 = vector.extract_strided_slice %324 {offsets = [0, 8], sizes = [12, 8], strides = [1, 1]} : vector<12x32xf32> to vector<12x8xf32>
    %cst_102 = arith.constant dense<0.000000e+00> : vector<4x8xf32>
    %356 = tpu.matmul %354, %355, %cst_102 {dimension_numbers = #tpu.dot_dimension_numbers<[1], [0], [0], [1], [0, 0, 1, 1], [], []>} : vector<4x12xf32>, vector<12x8xf32>, vector<4x8xf32> -> vector<4x8xf32>
    %357 = vector.extract_strided_slice %350 {offsets = [8, 0], sizes = [4, 12], strides = [1, 1]} : vector<16x12xf32> to vector<4x12xf32>
    %358 = vector.extract_strided_slice %324 {offsets = [0, 16], sizes = [12, 8], strides = [1, 1]} : vector<12x32xf32> to vector<12x8xf32>
    %cst_103 = arith.constant dense<0.000000e+00> : vector<4x8xf32>
    %359 = tpu.matmul %357, %358, %cst_103 {dimension_numbers = #tpu.dot_dimension_numbers<[1], [0], [0], [1], [0, 0, 1, 1], [], []>} : vector<4x12xf32>, vector<12x8xf32>, vector<4x8xf32> -> vector<4x8xf32>
    %360 = vector.extract_strided_slice %350 {offsets = [12, 0], sizes = [4, 12], strides = [1, 1]} : vector<16x12xf32> to vector<4x12xf32>
    %361 = vector.extract_strided_slice %324 {offsets = [0, 24], sizes = [12, 8], strides = [1, 1]} : vector<12x32xf32> to vector<12x8xf32>
    %cst_104 = arith.constant dense<0.000000e+00> : vector<4x8xf32>
    %362 = tpu.matmul %360, %361, %cst_104 {dimension_numbers = #tpu.dot_dimension_numbers<[1], [0], [0], [1], [0, 0, 1, 1], [], []>} : vector<4x12xf32>, vector<12x8xf32>, vector<4x8xf32> -> vector<4x8xf32>
    %363 = tpu.concatenate %353, %356, %359, %362 in 1 : vector<4x8xf32>, vector<4x8xf32>, vector<4x8xf32>, vector<4x8xf32> -> vector<4x32xf32>
    %cst_105 = arith.constant dense<0.000000e+00> : vector<4x32xf32>
    %364 = tpu.matmul %363, %256, %cst_105 {dimension_numbers = #tpu.dot_dimension_numbers<[1], [0], [0], [1], [0, 0, 1, 1], [], []>} : vector<4x32xf32>, vector<32x32xf32>, vector<4x32xf32> -> vector<4x32xf32>
    %365 = vector.broadcast %262 : vector<1x32xf32> to vector<4x32xf32>
    %366 = arith.addf %364, %365 : vector<4x32xf32>
    %367 = arith.addf %268, %366 : vector<4x32xf32>
    %cst_106 = arith.constant dense<0.000000e+00> : vector<4xf32>
    %368 = vector.multi_reduction <add>, %367, %cst_106 [1] : vector<4x32xf32> to vector<4xf32>
    %369 = vector.shape_cast %368 : vector<4xf32> to vector<4x1xf32>
    %cst_107 = arith.constant 3.200000e+01 : f32
    %370 = vector.broadcast %cst_107 : f32 to vector<4x1xf32>
    %371 = arith.divf %369, %370 : vector<4x1xf32>
    %372 = vector.broadcast %371 : vector<4x1xf32> to vector<4x32xf32>
    %373 = arith.subf %367, %372 : vector<4x32xf32>
    %374 = arith.mulf %373, %373 : vector<4x32xf32>
    %cst_108 = arith.constant dense<0.000000e+00> : vector<4xf32>
    %375 = vector.multi_reduction <add>, %374, %cst_108 [1] : vector<4x32xf32> to vector<4xf32>
    %376 = vector.shape_cast %375 : vector<4xf32> to vector<4x1xf32>
    %cst_109 = arith.constant 3.200000e+01 : f32
    %377 = vector.broadcast %cst_109 : f32 to vector<4x1xf32>
    %378 = arith.divf %376, %377 : vector<4x1xf32>
    %379 = vector.broadcast %371 : vector<4x1xf32> to vector<4x32xf32>
    %380 = arith.subf %367, %379 : vector<4x32xf32>
    %cst_110 = arith.constant 9.99999974E-6 : f32
    %381 = vector.broadcast %cst_110 : f32 to vector<4x1xf32>
    %382 = arith.addf %378, %381 : vector<4x1xf32>
    %383 = math.rsqrt %382 : vector<4x1xf32>
    %384 = vector.broadcast %383 : vector<4x1xf32> to vector<4x32xf32>
    %385 = arith.mulf %380, %384 : vector<4x32xf32>
    %386 = vector.broadcast %263 : vector<1x32xf32> to vector<4x32xf32>
    %387 = arith.mulf %385, %386 : vector<4x32xf32>
    %388 = vector.broadcast %264 : vector<1x32xf32> to vector<4x32xf32>
    %389 = arith.addf %387, %388 : vector<4x32xf32>
    %cst_111 = arith.constant dense<0.000000e+00> : vector<4x128xf32>
    %390 = tpu.matmul %389, %257, %cst_111 {dimension_numbers = #tpu.dot_dimension_numbers<[1], [0], [0], [1], [0, 0, 1, 1], [], []>} : vector<4x32xf32>, vector<32x128xf32>, vector<4x128xf32> -> vector<4x128xf32>
    %391 = vector.broadcast %265 : vector<1x128xf32> to vector<4x128xf32>
    %392 = arith.addf %390, %391 : vector<4x128xf32>
    %393 = arith.mulf %392, %392 : vector<4x128xf32>
    %394 = arith.mulf %392, %393 : vector<4x128xf32>
    %cst_112 = arith.constant 4.471500e-02 : f32
    %395 = vector.broadcast %cst_112 : f32 to vector<4x128xf32>
    %396 = arith.mulf %395, %394 : vector<4x128xf32>
    %397 = arith.addf %392, %396 : vector<4x128xf32>
    %cst_113 = arith.constant 0.797884583 : f32
    %398 = vector.broadcast %cst_113 : f32 to vector<4x128xf32>
    %399 = arith.mulf %398, %397 : vector<4x128xf32>
    %400 = math.tanh %399 : vector<4x128xf32>
    %cst_114 = arith.constant 1.000000e+00 : f32
    %401 = vector.broadcast %cst_114 : f32 to vector<4x128xf32>
    %402 = arith.addf %401, %400 : vector<4x128xf32>
    %cst_115 = arith.constant 5.000000e-01 : f32
    %403 = vector.broadcast %cst_115 : f32 to vector<4x128xf32>
    %404 = arith.mulf %403, %402 : vector<4x128xf32>
    %405 = arith.mulf %392, %404 : vector<4x128xf32>
    %cst_116 = arith.constant dense<0.000000e+00> : vector<4x32xf32>
    %406 = tpu.matmul %405, %258, %cst_116 {dimension_numbers = #tpu.dot_dimension_numbers<[1], [0], [0], [1], [0, 0, 1, 1], [], []>} : vector<4x128xf32>, vector<128x32xf32>, vector<4x32xf32> -> vector<4x32xf32>
    %407 = arith.addf %367, %406 : vector<4x32xf32>
    %408 = vector.broadcast %266 : vector<1x32xf32> to vector<4x32xf32>
    %409 = arith.addf %407, %408 : vector<4x32xf32>
    %410 = vector.extract_strided_slice %267 {offsets = [4, 0], sizes = [4, 32], strides = [1, 1]} : vector<16x128xf32> to vector<4x32xf32>
    %411 = vector.extract_strided_slice %267 {offsets = [8, 0], sizes = [4, 32], strides = [1, 1]} : vector<16x128xf32> to vector<4x32xf32>
    %cst_117 = arith.constant dense<0.000000e+00> : vector<4xf32>
    %412 = vector.multi_reduction <add>, %409, %cst_117 [1] : vector<4x32xf32> to vector<4xf32>
    %413 = vector.shape_cast %412 : vector<4xf32> to vector<4x1xf32>
    %cst_118 = arith.constant 3.200000e+01 : f32
    %414 = vector.broadcast %cst_118 : f32 to vector<4x1xf32>
    %415 = arith.divf %413, %414 : vector<4x1xf32>
    %416 = vector.broadcast %415 : vector<4x1xf32> to vector<4x32xf32>
    %417 = arith.subf %409, %416 : vector<4x32xf32>
    %418 = arith.mulf %417, %417 : vector<4x32xf32>
    %cst_119 = arith.constant dense<0.000000e+00> : vector<4xf32>
    %419 = vector.multi_reduction <add>, %418, %cst_119 [1] : vector<4x32xf32> to vector<4xf32>
    %420 = vector.shape_cast %419 : vector<4xf32> to vector<4x1xf32>
    %cst_120 = arith.constant 3.200000e+01 : f32
    %421 = vector.broadcast %cst_120 : f32 to vector<4x1xf32>
    %422 = arith.divf %420, %421 : vector<4x1xf32>
    %423 = vector.broadcast %415 : vector<4x1xf32> to vector<4x32xf32>
    %424 = arith.subf %409, %423 : vector<4x32xf32>
    %cst_121 = arith.constant 9.99999974E-6 : f32
    %425 = vector.broadcast %cst_121 : f32 to vector<4x1xf32>
    %426 = arith.addf %422, %425 : vector<4x1xf32>
    %427 = math.rsqrt %426 : vector<4x1xf32>
    %428 = vector.broadcast %427 : vector<4x1xf32> to vector<4x32xf32>
    %429 = arith.mulf %424, %428 : vector<4x32xf32>
    %430 = arith.mulf %429, %410 : vector<4x32xf32>
    %431 = arith.addf %430, %411 : vector<4x32xf32>
    %432 = vector.extract_strided_slice %431 {offsets = [0, 0], sizes = [2, 32], strides = [1, 1]} : vector<4x32xf32> to vector<2x32xf32>
    %433 = vector.extract_strided_slice %431 {offsets = [2, 0], sizes = [2, 32], strides = [1, 1]} : vector<4x32xf32> to vector<2x32xf32>
    %434 = tpu.concatenate %432, %433 in 1 : vector<2x32xf32>, vector<2x32xf32> -> vector<2x64xf32>
    %c96 = arith.constant 96 : index
    %c0_122 = arith.constant 0 : index
    %435 = vector.load %arg3[%c96, %c0_122] : memref<160x128xf32, #tpu.memory_space<vmem>>, vector<64x128xf32>
    %cst_123 = arith.constant dense<0.000000e+00> : vector<2x128xf32>
    %436 = tpu.matmul %434, %435, %cst_123 {dimension_numbers = #tpu.dot_dimension_numbers<[1], [0], [0], [1], [0, 0, 1, 1], [], []>} : vector<2x64xf32>, vector<64x128xf32>, vector<2x128xf32> -> vector<2x128xf32>
    %437 = vector.extract_strided_slice %267 {offsets = [12, 0], sizes = [1, 128], strides = [1, 1]} : vector<16x128xf32> to vector<1x128xf32>
    %438 = vector.broadcast %437 : vector<1x128xf32> to vector<2x128xf32>
    %439 = arith.addf %436, %438 : vector<2x128xf32>
    %cst_124 = arith.constant 0.000000e+00 : f32
    %440 = vector.broadcast %cst_124 : f32 to vector<6x128xf32>
    %441 = tpu.concatenate %439, %440 in 0 : vector<2x128xf32>, vector<6x128xf32> -> vector<8x128xf32>
    %c0_125 = arith.constant 0 : index
    %c0_126 = arith.constant 0 : index
    %442 = vector.load %arg5[%c0_125, %c0_126] : memref<8x128xf32, #tpu.memory_space<vmem>>, vector<8x128xf32>
    tpu.vector_store %arg5[%c0_125, %c0_126], %441 {strides = array<i32>} : memref<8x128xf32, #tpu.memory_space<vmem>>, vector<8x128xf32>,
    return
  }
}

</mosaic_0001>

<bundles_post_ra>
// kernel: dytox_forward.1
= control target key start
LH: loop header
LB: loop body
LE: loop exit
PB: predicated region body
PF: predicated region fallthrough
CT: control target
= control target key end

     0   :  { %v4497_v0 = vmov 0.0|0.0   ;;  %vm47_vm0 = vcmask 523264   ;;  %vm154_vm1 = vcmask 261120   ;;  %vm4498_vm2 = vmmov 0   ;;  %s4500_s6 = smov 120   ;;  %s4501_s7 = smov 96   ;;  %s5427_s1 = inlined_call_operand.vmem [shape: f32[672,32], index: 1, kind: input, shape index: {}]   ;;  %s5428_s0 = inlined_call_operand.vmem [shape: f32[8,192], index: 0, kind: input, shape index: {}]   ;;  %s5429_s4 = inlined_call_operand.vmem [shape: f32[96,128], index: 4, kind: input, shape index: {}]   ;;  %s5430_s2 = inlined_call_operand.vmem [shape: f32[96,96], index: 2, kind: input, shape index: {}]   ;;  %s5431_s3 = inlined_call_operand.vmem [shape: f32[160,128], index: 3, kind: input, shape index: {}]   ;;  %s5432_s5 = inlined_call_operand.vmem [shape: f32[8,128], index: 5, kind: output, shape index: {}]  }
   0x1   :  { %4164 = vmatprep.subr.bf16.mxu0 %v4497_v0  ;;  %v22_v1 = vld [vmem:[%s5427_s1] sm:$0xff]  ;;  %v23_v2 = vld [vmem:[%s5427_s1 + $0x8] sm:$0xff]  ;;  %v24_v3 = vld [vmem:[%s5427_s1 + $0x10] sm:$0xff]  ;;  %4200 = vmatprep.subr.bf16.mxu1 %v4497_v0  ;;  %v4499_v52 = vmov 0.0   ;;  %v169_v58 = vlaneseq  ;;  %s4502_s8 = smov 88   ;;  %s4503_s9 = smov 80  }
   0x2   :  { %v4165_v4 = vpack.c.bf16 %v23_v2, %v22_v1  ;;  %v25_v5 = vld [vmem:[%s5427_s1 + $0x18] sm:$0xff]  ;;  %v26_v7 = vld [vmem:[%s5427_s1 + $0x20] sm:$0xff]  ;;  %v27_v8 = vld [vmem:[%s5427_s1 + $0x28] sm:$0xff]  ;;  %3802 = vmatprep.mubr.msk.f32.mxu1 %vm4498_vm2, %v4499_v52  ;;  %s4504_s10 = smov 112   ;;  %s4505_s11 = smov 72   ;;  %vm259_vm3 = vcmask 64512  }
   0x3   :  { %v4168_v6 = vpack.c.bf16 %v25_v5, %v24_v3  ;;  %v4171_v9 = vpack.c.bf16 %v27_v8, %v26_v7  ;;  %v28_v10 = vld [vmem:[%s5427_s1 + $0x30] sm:$0xff]  ;;  %v29_v11 = vld [vmem:[%s5427_s1 + $0x38] sm:$0xff]  ;;  %v21_v12 = vld [vmem:[%s5428_s0 + $0x8] sm:$0xff]  ;;  %v4666_v60 = vshrl.u32 %v169_v58, 7  ;;  %s4506_s12 = smov 104   ;;  %s4507_s21 = smov 64  }
   0x4   :  { %4166 = vmatpush1.bf16.msra.mxu0 %v4165_v4  ;;  %3572 = vmatprep.mubr.msk.f32.mxu0 %vm47_vm0, %v21_v12  ;;  %v4174_v13 = vpack.c.bf16 %v29_v11, %v28_v10  ;;  %v30_v14 = vld [vmem:[%s5427_s1 + $0x40] sm:$0xff]  ;;  %v31_v15 = vld [vmem:[%s5427_s1 + $0x48] sm:$0xff]  ;;  %v32_v17 = vld [vmem:[%s5427_s1 + $0x50] sm:$0xff]  ;;  %s4509_s22 = smov 40   ;;  %s4510_s23 = smov 56   ;;  %vm933_vm4 = vcmask 130048  }
   0x5   :  { %4167 = vmatprep.subr.bf16.mxu0 %v4497_v0  ;;  %v4177_v16 = vpack.c.bf16 %v31_v15, %v30_v14  ;;  %v33_v18 = vld [vmem:[%s5427_s1 + $0x58] sm:$0xff]  ;;  %v34_v20 = vld [vmem:[%s5427_s1 + $0x60] sm:$0xff]  ;;  %v35_v21 = vld [vmem:[%s5427_s1 + $0x68] sm:$0xff]  ;;  %v4669_v61 = vsub.s32 0, %v4666_v60  ;;  %v4677_v63 = vsub.s32 1, %v4666_v60  ;;  %v4687_v7 = vsub.s32 2, %v4666_v60 }
   0x6   :  { %v4180_v19 = vpack.c.bf16 %v33_v18, %v32_v17  ;;  %v4183_v22 = vpack.c.bf16 %v35_v21, %v34_v20  ;;  %v36_v23 = vld [vmem:[%s5427_s1 + $0x70] sm:$0xff]  ;;  %v37_v24 = vld [vmem:[%s5427_s1 + $0x78] sm:$0xff]  ;;  %v38_v26 = vld [vmem:[%s5427_s1 + $0x80] sm:$0xff]  ;;  %s4511_s14 = smov 8   ;;  %s4512_s15 = smov 16   ;;  %vm935_vm5 = vcmask 195584  }
   0x7   :  { %v4186_v25 = vpack.c.bf16 %v37_v24, %v36_v23  ;;  %v39_v27 = vld [vmem:[%s5427_s1 + $0x88] sm:$0xff]  ;;  %v40_v29 = vld [vmem:[%s5427_s1 + $0x90] sm:$0xff]  ;;  %v41_v30 = vld [vmem:[%s5427_s1 + $0x98] sm:$0xff]  ;;  %s4513_s16 = smov 24   ;;  %vm2401_vm6 = vcmask 257024   ;;  %vm2493_vm7 = vcmask 1043456  }
   0x8   :  { %4169 = vmatpush1.bf16.msra.mxu0 %v4168_v6  ;;  %v4189_v28 = vpack.c.bf16 %v39_v27, %v38_v26  ;;  %v4192_v31 = vpack.c.bf16 %v41_v30, %v40_v29  ;;  %v42_v32 = vld [vmem:[%s5427_s1 + $0xa0] sm:$0xff]  ;;  %v43_v33 = vld [vmem:[%s5427_s1 + $0xa8] sm:$0xff]  ;;  %v44_v35 = vld [vmem:[%s5427_s1 + $0xb0] sm:$0xff]  ;;  %vm2835_vm9 = vcmask 97280   ;;  %vm4514_vm10 = vmmov 1  }
   0x9   :  { %4170 = vmatprep.subr.bf16.mxu0 %v4497_v0  ;;  %v4195_v34 = vpack.c.bf16 %v43_v33, %v42_v32  ;;  %v45_v36 = vld [vmem:[%s5427_s1 + $0xb8] sm:$0xff]  ;;  %v20_v38 = vld [vmem:[%s5428_s0] sm:$0xff]  ;;  %v127_v50 = vld [vmem:[%s5430_s2 + $0x8] sm:$0xff]  ;;  %s4508_s0 = smov 48   ;;  %vm3565_vm12 = vcmask 1041408  }
   0xa   :  { %v4198_v37 = vpack.c.bf16 %v45_v36, %v44_v35  ;;  %v46_v39 = vld [vmem:[%s5429_s4] sm:$0xff]  ;;  %v128_v51 = vld [vmem:[%s5430_s2 + $0x10] sm:$0xff]  ;;  %v129_v54 = vld [vmem:[%s5430_s2 + $0x18] sm:$0xff] }
   0xb   :  { %v126_v49 = vld [vmem:[%s5430_s2] sm:$0xff]  ;;  %v4204_v55 = vpack.c.bf16 %v129_v54, %v128_v51  ;;  %v4674_v62 = vld [vmem:[%s5429_s4 + $0x48] sm:$0xff]  ;;  %v4737_v23 = vld [vmem:[%s5429_s4 + $0x10] sm:$0xff] }
   0xc   :  { %4172 = vmatpush1.bf16.msra.mxu0 %v4171_v9  ;;  %v4201_v53 = vpack.c.bf16 %v127_v50, %v126_v49  ;;  %v172_v1 = vrot.slane %v4674_v62, %v4669_v61  ;;  %v177_v4 = vrot.slane %v4674_v62, %v4677_v63  ;;  %v182_v8 = vrot.slane %v4674_v62, %v4687_v7  ;;  %v4745_v29 = vld [vmem:[%s5429_s4 + $0x18] sm:$0xff]  ;;  %vm5198_vm8 = vmpackc.low %vm259_vm3, %vm259_vm3 }
   0xd   :  { %4173 = vmatprep.subr.bf16.mxu0 %v4497_v0  ;;  %vm5243_vm11 = vmpackc.low %vm2493_vm7, %vm4514_vm10 }
   0xe   :  { %4202 = vmatpush3.bf16.msra.mxu1 %v4201_v53 }
   0xf   :  { %4203 = vmatprep.subr.bf16.mxu1 %v4497_v0 }
  0x10   :  { %4175 = vmatpush1.bf16.msra.mxu0 %v4174_v13 }
  0x11   :  { %4176 = vmatprep.subr.bf16.mxu0 %v4497_v0 }
  0x12   :  { %4205 = vmatpush3.bf16.msra.mxu1 %v4204_v55 }
  0x13   :  { %3805 = vmatprep.subr.mxu1 %v4499_v52 }
  0x14   :  { %4178 = vmatpush1.bf16.msra.mxu0 %v4177_v16 }
  0x15   :  { %4179 = vmatprep.subr.bf16.mxu0 %v4497_v0 }
  0x18   :  { %4181 = vmatpush1.bf16.msra.mxu0 %v4180_v19  ;;  %v4731_v19 = vld [vmem:[%s5429_s4 + $0x8] sm:$0xff] }
  0x19   :  { %4182 = vmatprep.subr.bf16.mxu0 %v4497_v0 }
  0x1c   :  { %4184 = vmatpush1.bf16.msra.mxu0 %v4183_v22 }
  0x1d   :  { %4185 = vmatprep.subr.bf16.mxu0 %v4497_v0 }
  0x20   :  { %4187 = vmatpush1.bf16.msra.mxu0 %v4186_v25 }
  0x21   :  { %4188 = vmatprep.subr.bf16.mxu0 %v4497_v0 }
  0x24   :  { %4190 = vmatpush1.bf16.msra.mxu0 %v4189_v28 }
  0x25   :  { %4191 = vmatprep.subr.bf16.mxu0 %v4497_v0 }
  0x28   :  { %4193 = vmatpush1.bf16.msra.mxu0 %v4192_v31 }
  0x29   :  { %4194 = vmatprep.subr.bf16.mxu0 %v4497_v0 }
  0x2c   :  { %4196 = vmatpush1.bf16.msra.mxu0 %v4195_v34  ;;  %v4752_v34 = vld [vmem:[%s5429_s4 + $0x20] sm:$0xff] }
  0x2d   :  { %4197 = vmatprep.subr.bf16.mxu0 %v4497_v0 }
  0x30   :  { %4199 = vmatpush1.bf16.msra.mxu0 %v4198_v37 }
  0x31   :  { %4242 = vmatprep.subr.bf16.mxu0 %v4497_v0 }
  0x33   :  { %116 = vmatmul.mubr.f32.vlgmr.msra.gmra.mrb[0].mxu0 %v20_v38 }
  0x34   :  { %3910 = vmatprep.mubr.msk.f32.mxu0 %vm4498_vm2, %v4499_v52 }
 0x106   :  { %v117_v40 = vpop.f32.mrb[0].mxu0 }
 0x107   :  { %v4642_v41 = vadd.f32 %v117_v40, %v46_v39  ;;  %v119_v42 = vpop.f32.mrb[1].mxu0 }
 0x109   :  { %v155_v43 = vsel %vm154_vm1, %v4642_v41, 0.0 }
 0x10a   :  { %156 = vadd.xlane.f32.xlu0 %v155_v43 }
 0x197   :  { %v157_v44 = vpop.xlane.xlu0 %156 }
 0x198   :  { %v159_v45 = vmul.f32 0.03125, %v157_v44 }
 0x19a   :  { %v160_v46 = vsub.f32 %v4642_v41, %v159_v45 }
 0x19c   :  { %v161_v47 = vmul.f32 %v160_v46, %v160_v46 }
 0x19e   :  { %v162_v48 = vsel %vm154_vm1, %v161_v47, 0.0 }
 0x19f   :  { %163 = vadd.xlane.f32.xlu0 %v162_v48 }
 0x22c   :  { %v164_v56 = vpop.xlane.xlu0 %163 }
 0x22d   :  { %v165_v57 = vmul.f32 0.03125, %v164_v56 }
 0x22f   :  { %v166_v59 = vadd.f32 1e-05, %v165_v57 }
 0x231   :  { %4435 = vrsqrt.f32 %v166_v59 }
 0x23b   :  { %v4436_v2 = vpop.eup %4435 }
 0x23c   :  { %v168_v3 = vmul.f32 %v4436_v2, %v160_v46 }
 0x23e   :  { %v173_v5 = vmul.f32 %v172_v1, %v168_v3 }
 0x240   :  { %v178_v6 = vadd.f32 %v177_v4, %v173_v5 }
 0x242   :  { %3803 = vmatmul.mubr.msk.f32.vlgmr.msra.gmra.mrb[0].mxu1 %vm154_vm1, %v178_v6 }
 0x243   :  { %3807 = vmatprep.mubr.msk.f32.mxu1 %vm4498_vm2, %v4499_v52 }
 0x315   :  { %v252_v9 = vpop.f32.mrb[0].mxu1 }
 0x316   :  { %v4691_v10 = vadd.f32 %v252_v9, %v182_v8  ;;  %v3804_v11 = vpop.f32.mrb[1].mxu1 }
 0x318   :  { %334 = vrot.lane.b32.xlu0 %v4691_v10, %s4500_s6  ;;  %257 = vrot.lane.b32.xlu1 %v4691_v10, %s4501_s7 }
 0x31c   :  { %336 = vrot.lane.b32.xlu1 %v4691_v10, %s4502_s8 }
 0x320   :  { %414 = vrot.lane.b32.xlu1 %v4691_v10, %s4503_s9 }
 0x324   :  { %412 = vrot.lane.b32.xlu1 %v4691_v10, %s4504_s10 }
 0x328   :  { %492 = vrot.lane.b32.xlu1 %v4691_v10, %s4505_s11 }
 0x32c   :  { %490 = vrot.lane.b32.xlu1 %v4691_v10, %s4506_s12 }
 0x38a   :  { %v258_v12 = vpop.permute.xlu1 %257  ;;  %v335_v14 = vpop.permute.xlu0 %334 }
 0x38b   :  { %3806 = vmatpush3.xpose.msk.msra.mxu1 %vm259_vm3, %v258_v12 }
 0x38c   :  { %3810 = vmatprep.subr.mxu1 %v4499_v52 }
 0x38e   :  { %3808 = vmatmul.mubr.msk.f32.vlgmr.msra.gmra.mrb[2].mxu1 %vm259_vm3, %v4691_v10  ;;  %v337_v13 = vpop.permute.xlu1 %336 }
 0x38f   :  { %3811 = vmatpush3.xpose.msk.msra.mxu1 %vm259_vm3, %v337_v13  ;;  %3812 = vmatprep.mubr.msk.f32.mxu1 %vm4498_vm2, %v4499_v52 }
 0x390   :  { %3815 = vmatprep.subr.mxu1 %v4499_v52 }
 0x392   :  { %3813 = vmatmul.mubr.msk.f32.vlgmr.msra.gmra.mrb[4].mxu1 %vm259_vm3, %v335_v14  ;;  %v415_v15 = vpop.permute.xlu1 %414 }
 0x393   :  { %3816 = vmatpush3.xpose.msk.msra.mxu1 %vm259_vm3, %v415_v15  ;;  %3817 = vmatprep.mubr.msk.f32.mxu1 %vm4498_vm2, %v4499_v52 }
 0x394   :  { %3820 = vmatprep.subr.mxu1 %v4499_v52 }
 0x396   :  { %v413_v16 = vpop.permute.xlu1 %412 }
 0x397   :  { %3818 = vmatmul.mubr.msk.f32.vlgmr.msra.gmra.mrb[6].mxu1 %vm259_vm3, %v413_v16 }
 0x398   :  { %3822 = vmatprep.mubr.msk.f32.mxu1 %vm4498_vm2, %v4499_v52 }
 0x39a   :  { %v493_v17 = vpop.permute.xlu1 %492 }
 0x39b   :  { %3821 = vmatpush3.xpose.msk.msra.mxu1 %vm259_vm3, %v493_v17 }
 0x39c   :  { %3825 = vmatprep.subr.mxu1 %v4499_v52 }
 0x39e   :  { %v491_v18 = vpop.permute.xlu1 %490 }
 0x39f   :  { %3823 = vmatmul.mubr.msk.f32.vlgmr.msra.gmra.mrb[8].mxu1 %vm259_vm3, %v491_v18 }
 0x3a0   :  { %3827 = vmatprep.mubr.msk.f32.mxu1 %vm4498_vm2, %v4499_v52 }
 0x461   :  { %v330_v20 = vpop.f32.mrb[2].mxu1 }
 0x462   :  { %v568_v21 = vadd.f32 %v330_v20, %v4731_v19  ;;  %v3809_v22 = vpop.f32.mrb[3].mxu1  ;;  %v130_v20 = vld [vmem:[%s5427_s1 + $0xc0] sm:$0xff] }
 0x464   :  { %v572_v24 = vsel %vm259_vm3, %v568_v21, -inf }
 0x465   :  { %573 = vmax.xlane.f32.xlu1 %v572_v24  ;;  %v408_v25 = vpop.f32.mrb[4].mxu1 }
 0x466   :  { %v569_v26 = vadd.f32 %v408_v25, %v4737_v23  ;;  %v3814_v27 = vpop.f32.mrb[5].mxu1 }
 0x467   :  { %v133_v27 = vld [vmem:[%s5427_s1 + $0xd8] sm:$0xff] }
 0x468   :  { %v575_v28 = vsel %vm259_vm3, %v569_v26, -inf }
 0x469   :  { %576 = vmax.xlane.f32.xlu0 %v575_v28 }
 0x46a   :  { %v486_v30 = vpop.f32.mrb[6].mxu1 }
 0x46b   :  { %v570_v31 = vadd.f32 %v486_v30, %v4745_v29  ;;  %v3819_v32 = vpop.f32.mrb[7].mxu1 }
 0x46d   :  { %v578_v33 = vsel %vm259_vm3, %v570_v31, -inf }
 0x46e   :  { %579 = vmax.xlane.f32.xlu1 %v578_v33 }
 0x472   :  { %v564_v35 = vpop.f32.mrb[8].mxu1 }
 0x473   :  { %v571_v36 = vadd.f32 %v564_v35, %v4752_v34  ;;  %v3824_v37 = vpop.f32.mrb[9].mxu1 }
 0x475   :  { %v581_v38 = vsel %vm259_vm3, %v571_v36, -inf }
 0x476   :  { %582 = vmax.xlane.f32.xlu0 %v581_v38 }
 0x47f   :  { %616 = vrot.lane.b32.xlu1 %v4691_v10, %s4507_s21 }
 0x4f2   :  { %v574_v39 = vpop.xlane.xlu1 %573 }
 0x4f3   :  { %v584_v40 = vsub.f32 %v568_v21, %v574_v39  ;;  %v131_v21 = vld [vmem:[%s5427_s1 + $0xc8] sm:$0xff] }
 0x4f4   :  { %v4207_v22 = vpack.c.bf16 %v131_v21, %v130_v20  ;;  %v141_v20 = vld [vmem:[%s5427_s1 + $0xf8] sm:$0xff] }
 0x4f5   :  { %v588_v42 = vmul.f32 1.442695, %v584_v40 }
 0x4f6   :  { %v577_v43 = vpop.xlane.xlu0 %576 }
 0x4f7   :  { %4437 = vpow2.f32 %v588_v42  ;;  %v585_v44 = vsub.f32 %v569_v26, %v577_v43  ;;  %v132_v26 = vld [vmem:[%s5427_s1 + $0xd0] sm:$0xff] }
 0x4f8   :  { %v4210_v28 = vpack.c.bf16 %v133_v27, %v132_v26  ;;  %v144_v26 = vld [vmem:[%s5427_s1 + $0x110] sm:$0xff]  ;;  %v145_v27 = vld [vmem:[%s5427_s1 + $0x118] sm:$0xff] }
 0x4f9   :  { %v590_v45 = vmul.f32 1.442695, %v585_v44  ;;  %v4808_v44 = vsub.s32 3, %v4666_v60 }
 0x4fb   :  { %4439 = vpow2.f32 %v590_v45  ;;  %v580_v46 = vpop.xlane.xlu1 %579  ;;  %v940_v45 = vrot.slane %v4674_v62, %v4808_v44 }
 0x4fc   :  { %v586_v47 = vsub.f32 %v570_v31, %v580_v46 }
 0x4fe   :  { %v592_v48 = vmul.f32 1.442695, %v586_v47 }
 0x4ff   :  { %v617_v49 = vpop.permute.xlu1 %616 }
 0x500   :  { %4441 = vpow2.f32 %v592_v48  ;;  %3826 = vmatpush3.msra.mxu1 %v617_v49 }
 0x501   :  { %v4438_v50 = vpop.eup %4437  ;;  %3830 = vmatprep.subr.mxu1 %v4499_v52 }
 0x502   :  { %v596_v51 = vsel %vm259_vm3, %v4438_v50, 0.0 }
 0x503   :  { %597 = vadd.xlane.f32.xlu1 %v596_v51  ;;  %v583_v53 = vpop.xlane.xlu0 %582 }
 0x504   :  { %v587_v54 = vsub.f32 %v571_v36, %v583_v53 }
 0x505   :  { %v4440_v55 = vpop.eup %4439 }
 0x506   :  { %v594_v56 = vmul.f32 1.442695, %v587_v54  ;;  %v599_v57 = vsel %vm259_vm3, %v4440_v55, 0.0 }
 0x507   :  { %600 = vadd.xlane.f32.xlu0 %v599_v57  ;;  %v134_v57 = vld [vmem:[%s5431_s3] sm:$0xff] }
 0x508   :  { %4443 = vpow2.f32 %v594_v56 }
 0x50a   :  { %v4442_v58 = vpop.eup %4441 }
 0x50b   :  { %v602_v59 = vsel %vm259_vm3, %v4442_v58, 0.0 }
 0x50c   :  { %603 = vadd.xlane.f32.xlu1 %v602_v59  ;;  %v136_v59 = vld [vmem:[%s5431_s3 + $0x10] sm:$0xff] }
 0x512   :  { %v4444_v1 = vpop.eup %4443 }
 0x513   :  { %v605_v2 = vsel %vm259_vm3, %v4444_v1, 0.0 }
 0x514   :  { %606 = vadd.xlane.f32.xlu0 %v605_v2 }
 0x51d   :  { %768 = vrot.lane.b32.xlu1 %v4691_v10, %s4508_s0 }
 0x521   :  { %844 = vrot.lane.b32.xlu1 %v4691_v10, %s4509_s22 }
 0x52a   :  { %692 = vrot.lane.b32.xlu0 %v4691_v10, %s4510_s23 }
 0x590   :  { %v598_v3 = vpop.xlane.xlu1 %597 }
 0x591   :  { %4445 = vrcp.f32 %v598_v3 }
 0x594   :  { %v601_v4 = vpop.xlane.xlu0 %600 }
 0x595   :  { %4447 = vrcp.f32 %v601_v4 }
 0x599   :  { %v604_v5 = vpop.xlane.xlu1 %603 }
 0x59a   :  { %4449 = vrcp.f32 %v604_v5 }
 0x59b   :  { %v4446_v6 = vpop.eup %4445 }
 0x59c   :  { %v612_v8 = vmul.f32 %v4446_v6, %v4438_v50  ;;  %v4834_v6 = vsub.s32 4, %v4666_v60 }
 0x59d   :  { %v769_v13 = vpop.permute.xlu1 %768 }
 0x59e   :  { %3828 = vmatmul.mubr.msk.f32.vlgmr.msra.gmra.mrb[10].mxu1 %vm259_vm3, %v612_v8  ;;  %v4837_v8 = vsub.s32 5, %v4666_v60 }
 0x59f   :  { %3832 = vmatprep.mubr.msk.f32.mxu1 %vm4498_vm2, %v4499_v52  ;;  %v4448_v11 = vpop.eup %4447 }
 0x5a0   :  { %v613_v12 = vmul.f32 %v4448_v11, %v4440_v55 }
 0x5a1   :  { %v607_v9 = vpop.xlane.xlu0 %606  ;;  %v845_v16 = vpop.permute.xlu1 %844 }
 0x5a2   :  { %4451 = vrcp.f32 %v607_v9  ;;  %v1031_v9 = vrot.slane %v4674_v62, %v4834_v6 }
 0x5a4   :  { %v4450_v10 = vpop.eup %4449 }
 0x5a5   :  { %v693_v14 = vpop.permute.xlu0 %692  ;;  %v614_v15 = vmul.f32 %v4450_v10, %v4442_v58  ;;  %v139_v10 = vld [vmem:[%s5427_s1 + $0xe8] sm:$0xff] }
 0x5a6   :  { %3831 = vmatpush3.msra.mxu1 %v693_v14  ;;  %v138_v14 = vld [vmem:[%s5427_s1 + $0xe0] sm:$0xff] }
 0x5a7   :  { %3833 = vmatmul.mubr.msk.f32.vlgmr.msra.gmra.mrb[12].mxu1 %vm259_vm3, %v613_v12  ;;  %3835 = vmatprep.subr.mxu1 %v4499_v52 }
 0x5a8   :  { %3836 = vmatpush3.msra.mxu1 %v769_v13  ;;  %3837 = vmatprep.mubr.msk.f32.mxu1 %vm4498_vm2, %v4499_v52  ;;  %v1036_v13 = vrot.slane %v4674_v62, %v4837_v8 }
 0x5a9   :  { %3840 = vmatprep.subr.mxu1 %v4499_v52 }
 0x5ab   :  { %3838 = vmatmul.mubr.msk.f32.vlgmr.msra.gmra.mrb[14].mxu1 %vm259_vm3, %v614_v15 }
 0x5ac   :  { %v4452_v17 = vpop.eup %4451  ;;  %3841 = vmatpush3.msra.mxu1 %v845_v16  ;;  %3842 = vmatprep.mubr.msk.f32.mxu1 %vm4498_vm2, %v4499_v52  ;;  %v4219_v16 = vpack.c.bf16 %v139_v10, %v138_v14 }
 0x5ad   :  { %v615_v18 = vmul.f32 %v4452_v17, %v4444_v1  ;;  %4206 = vmatprep.subr.bf16.mxu1 %v4497_v0  ;;  %v137_v1 = vld [vmem:[%s5431_s3 + $0x18] sm:$0xff] }
 0x5ae   :  { %v4216_v2 = vpack.c.bf16 %v137_v1, %v136_v59  ;;  %v4910_v1 = vsub.s32 7, %v4666_v60 }
 0x5af   :  { %3843 = vmatmul.mubr.msk.f32.vlgmr.msra.gmra.mrb[16].mxu1 %vm259_vm3, %v615_v18  ;;  %v140_v18 = vld [vmem:[%s5427_s1 + $0xf0] sm:$0xff] }
 0x5b0   :  { %3853 = vmatprep.mubr.msk.f32.mxu1 %vm4498_vm2, %v4499_v52  ;;  %4208 = vmatpush3.bf16.msra.mxu1 %v4207_v22  ;;  %v4222_v21 = vpack.c.bf16 %v141_v20, %v140_v18  ;;  %v142_v22 = vld [vmem:[%s5427_s1 + $0x100] sm:$0xff] }
 0x5b1   :  { %4209 = vmatprep.subr.bf16.mxu1 %v4497_v0 }
 0x5b4   :  { %4211 = vmatpush3.bf16.msra.mxu1 %v4210_v28  ;;  %v4228_v28 = vpack.c.bf16 %v145_v27, %v144_v26 }
 0x5b5   :  { %4212 = vmatprep.subr.bf16.mxu1 %v4497_v0 }
 0x671   :  { %v688_v24 = vpop.f32.mrb[10].mxu1 }
 0x672   :  { %v3829_v25 = vpop.f32.mrb[11].mxu1 }
 0x67a   :  { %v764_v30 = vpop.f32.mrb[12].mxu1 }
 0x67b   :  { %921 = vrot.lane.b32.xlu0 %v764_v30, %s4511_s14  ;;  %v3834_v31 = vpop.f32.mrb[13].mxu1  ;;  %v146_v30 = vld [vmem:[%s5427_s1 + $0x120] sm:$0xff] }
 0x67c   :  { %v147_v31 = vld [vmem:[%s5427_s1 + $0x128] sm:$0xff] }
 0x67e   :  { %v840_v32 = vpop.f32.mrb[14].mxu1 }
 0x67f   :  { %925 = vrot.lane.b32.xlu1 %v840_v32, %s4512_s15  ;;  %v3839_v33 = vpop.f32.mrb[15].mxu1  ;;  %v148_v32 = vld [vmem:[%s5427_s1 + $0x130] sm:$0xff] }
 0x680   :  { %v4231_v33 = vpack.c.bf16 %v147_v31, %v146_v30 }
 0x682   :  { %v916_v35 = vpop.f32.mrb[16].mxu1 }
 0x683   :  { %929 = vrot.lane.b32.xlu0 %v916_v35, %s4513_s16  ;;  %v3844_v36 = vpop.f32.mrb[17].mxu1  ;;  %v149_v35 = vld [vmem:[%s5427_s1 + $0x138] sm:$0xff] }
 0x684   :  { %v4234_v36 = vpack.c.bf16 %v149_v35, %v148_v32 }
 0x6ed   :  { %v922_v37 = vpop.permute.xlu0 %921 }
 0x6ee   :  { %v932_v39 = vsel %vm259_vm3, %v688_v24, %v922_v37  ;;  %v143_v24 = vld [vmem:[%s5427_s1 + $0x108] sm:$0xff]  ;;  %v150_v37 = vld [vmem:[%s5427_s1 + $0x140] sm:$0xff] }
 0x6ef   :  { %v4225_v25 = vpack.c.bf16 %v143_v24, %v142_v22  ;;  %v4938_v24 = vld [vmem:[%s5429_s4 + $0x50] sm:$0xff] }
 0x6f0   :  { %v1255_v32 = vrot.slane %v4938_v24, %v4687_v7 }
 0x6f1   :  { %v926_v38 = vpop.permute.xlu1 %925 }
 0x6f2   :  { %v934_v40 = vsel %vm933_vm4, %v932_v39, %v926_v38  ;;  %v151_v38 = vld [vmem:[%s5427_s1 + $0x148] sm:$0xff] }
 0x6f3   :  { %v4237_v39 = vpack.c.bf16 %v151_v38, %v150_v37 }
 0x6f5   :  { %v930_v42 = vpop.permute.xlu0 %929 }
 0x6f6   :  { %v936_v43 = vsel %vm935_vm5, %v934_v40, %v930_v42  ;;  %v152_v40 = vld [vmem:[%s5427_s1 + $0x150] sm:$0xff]  ;;  %v153_v42 = vld [vmem:[%s5427_s1 + $0x158] sm:$0xff] }
 0x6f7   :  { %3854 = vmatmul.mubr.msk.f32.vlgmr.msra.gmra.mrb[18].mxu1 %vm154_vm1, %v936_v43  ;;  %v4240_v43 = vpack.c.bf16 %v153_v42, %v152_v40 }
 0x6f8   :  { %3864 = vmatprep.mubr.msk.f32.mxu1 %vm4498_vm2, %v4499_v52 }
 0x7ca   :  { %v1010_v46 = vpop.f32.mrb[18].mxu1 }
 0x7cb   :  { %v1011_v47 = vadd.f32 %v1010_v46, %v940_v45  ;;  %v3855_v48 = vpop.f32.mrb[19].mxu1  ;;  %v4903_v45 = vsub.s32 6, %v4666_v60 }
 0x7cd   :  { %v4813_v49 = vadd.f32 %v1011_v47, %v4642_v41  ;;  %v135_v41 = vld [vmem:[%s5431_s3 + $0x8] sm:$0xff]  ;;  %v1041_v46 = vrot.slane %v4674_v62, %v4903_v45 }
 0x7ce   :  { %v4213_v58 = vpack.c.bf16 %v135_v41, %v134_v57 }
 0x7cf   :  { %v1015_v50 = vsel %vm154_vm1, %v4813_v49, 0.0 }
 0x7d0   :  { %1016 = vadd.xlane.f32.xlu1 %v1015_v50  ;;  %4214 = vmatpush3.bf16.msra.mxu1 %v4213_v58 }
 0x7d1   :  { %4215 = vmatprep.subr.bf16.mxu1 %v4497_v0 }
 0x7d4   :  { %4217 = vmatpush3.bf16.msra.mxu1 %v4216_v2  ;;  %v1198_v2 = vrot.slane %v4674_v62, %v4910_v1  ;;  %v1201_v62 = vld [vmem:[%s5430_s2 + $0x20] sm:$0xff] }
 0x7d5   :  { %4218 = vmatprep.subr.bf16.mxu1 %v4497_v0 }
 0x85d   :  { %v1017_v51 = vpop.xlane.xlu1 %1016 }
 0x85e   :  { %v1018_v53 = vmul.f32 0.03125, %v1017_v51 }
 0x860   :  { %v1019_v54 = vsub.f32 %v4813_v49, %v1018_v53 }
 0x862   :  { %v1020_v55 = vmul.f32 %v1019_v54, %v1019_v54 }
 0x864   :  { %v1021_v56 = vsel %vm154_vm1, %v1020_v55, 0.0 }
 0x865   :  { %1022 = vadd.xlane.f32.xlu0 %v1021_v56 }
 0x8f2   :  { %v1023_v3 = vpop.xlane.xlu0 %1022 }
 0x8f3   :  { %v1024_v4 = vmul.f32 0.03125, %v1023_v3 }
 0x8f5   :  { %v1025_v5 = vadd.f32 1e-05, %v1024_v4 }
 0x8f7   :  { %4453 = vrsqrt.f32 %v1025_v5 }
 0x901   :  { %v4454_v11 = vpop.eup %4453 }
 0x902   :  { %v1027_v12 = vmul.f32 %v4454_v11, %v1019_v54 }
 0x904   :  { %v1032_v15 = vmul.f32 %v1031_v9, %v1027_v12 }
 0x906   :  { %v1037_v17 = vadd.f32 %v1036_v13, %v1032_v15 }
 0x908   :  { %3865 = vmatmul.mubr.msk.f32.vlgmr.msra.gmra.mrb[20].mxu1 %vm154_vm1, %v1037_v17  ;;  %v1204_v17 = vld [vmem:[%s5430_s2 + $0x38] sm:$0xff] }
 0x909   :  { %4220 = vmatpush3.bf16.msra.mxu1 %v4219_v16  ;;  %3899 = vmatprep.mubr.msk.f32.mxu1 %vm4498_vm2, %v4499_v52  ;;  %v1203_v16 = vld [vmem:[%s5430_s2 + $0x30] sm:$0xff] }
 0x90a   :  { %4221 = vmatprep.subr.bf16.mxu1 %v4497_v0  ;;  %v4246_v18 = vpack.c.bf16 %v1204_v17, %v1203_v16 }
 0x90d   :  { %4223 = vmatpush3.bf16.msra.mxu1 %v4222_v21 }
 0x90e   :  { %4224 = vmatprep.subr.bf16.mxu1 %v4497_v0 }
 0x911   :  { %4226 = vmatpush3.bf16.msra.mxu1 %v4225_v25  ;;  %v1245_v25 = vrot.slane %v4938_v24, %v4669_v61 }
 0x912   :  { %4227 = vmatprep.subr.bf16.mxu1 %v4497_v0 }
 0x915   :  { %4229 = vmatpush3.bf16.msra.mxu1 %v4228_v28  ;;  %v1250_v28 = vrot.slane %v4938_v24, %v4677_v63 }
 0x916   :  { %4230 = vmatprep.subr.bf16.mxu1 %v4497_v0 }
 0x919   :  { %4232 = vmatpush3.bf16.msra.mxu1 %v4231_v33 }
 0x91a   :  { %4233 = vmatprep.subr.bf16.mxu1 %v4497_v0 }
 0x91d   :  { %4235 = vmatpush3.bf16.msra.mxu1 %v4234_v36 }
 0x91e   :  { %4236 = vmatprep.subr.bf16.mxu1 %v4497_v0 }
 0x921   :  { %4238 = vmatpush3.bf16.msra.mxu1 %v4237_v39 }
 0x922   :  { %4239 = vmatprep.subr.bf16.mxu1 %v4497_v0 }
 0x925   :  { %4241 = vmatpush3.bf16.msra.mxu1 %v4240_v43 }
 0x926   :  { %3938 = vmatprep.subr.mxu1 %v4499_v52 }
 0x9db   :  { %v1111_v47 = vpop.f32.mrb[20].mxu1 }
 0x9dc   :  { %v1112_v48 = vadd.f32 %v1111_v47, %v1041_v46  ;;  %v3866_v50 = vpop.f32.mrb[21].mxu1 }
 0x9de   :  { %v1115_v51 = vmul.f32 %v1112_v48, %v1112_v48 }
 0x9e0   :  { %v1116_v53 = vmul.f32 %v1115_v51, %v1112_v48 }
 0x9e2   :  { %v1117_v54 = vmul.f32 0.044715, %v1116_v53 }
 0x9e4   :  { %v1118_v55 = vadd.f32 %v1117_v54, %v1112_v48 }
 0x9e6   :  { %v1119_v56 = vmul.f32 0.7978846, %v1118_v55 }
 0x9e8   :  { %4455 = vtanh.f32 %v1119_v56 }
 0x9f2   :  { %v4456_v57 = vpop.eup %4455 }
 0x9f3   :  { %v1121_v41 = vadd.f32 1.0, %v4456_v57 }
 0x9f5   :  { %v1122_v58 = vmul.f32 0.5, %v1121_v41 }
 0x9f7   :  { %v1123_v59 = vmul.f32 %v1122_v58, %v1112_v48 }
 0x9f9   :  { %3900 = vmatmul.mubr.f32.vlgmr.msra.gmra.mrb[22].mxu1 %v1123_v59 }
 0x9fa   :  { %3940 = vmatprep.mubr.msk.f32.mxu1 %vm4498_vm2, %v4499_v52 }
 0xacc   :  { %v1190_v3 = vpop.f32.mrb[22].mxu1 }
 0xacd   :  { %v1194_v4 = vadd.f32 %v1190_v3, %v4813_v49  ;;  %v3901_v5 = vpop.f32.mrb[23].mxu1  ;;  %v1202_v49 = vld [vmem:[%s5430_s2 + $0x28] sm:$0xff] }
 0xace   :  { %v4243_v15 = vpack.c.bf16 %v1202_v49, %v1201_v62 }
 0xacf   :  { %v4915_v9 = vadd.f32 %v1198_v2, %v1194_v4 }
 0xad0   :  { %4244 = vmatpush3.bf16.msra.mxu0 %v4243_v15 }
 0xad1   :  { %v1229_v11 = vsel %vm154_vm1, %v4915_v9, 0.0  ;;  %4245 = vmatprep.subr.bf16.mxu0 %v4497_v0 }
 0xad2   :  { %1230 = vadd.xlane.f32.xlu0 %v1229_v11 }
 0xad4   :  { %4247 = vmatpush3.bf16.msra.mxu0 %v4246_v18 }
 0xad5   :  { %3913 = vmatprep.subr.mxu0 %v4499_v52 }
 0xb5f   :  { %v1231_v12 = vpop.xlane.xlu0 %1230 }
 0xb60   :  { %v1232_v13 = vmul.f32 0.03125, %v1231_v12 }
 0xb62   :  { %v1233_v14 = vsub.f32 %v4915_v9, %v1232_v13 }
 0xb64   :  { %v1234_v10 = vmul.f32 %v1233_v14, %v1233_v14 }
 0xb66   :  { %v1235_v60 = vsel %vm154_vm1, %v1234_v10, 0.0 }
 0xb67   :  { %1236 = vadd.xlane.f32.xlu1 %v1235_v60 }
 0xbf4   :  { %v1237_v20 = vpop.xlane.xlu1 %1236 }
 0xbf5   :  { %v1238_v21 = vmul.f32 0.03125, %v1237_v20 }
 0xbf7   :  { %v1239_v22 = vadd.f32 1e-05, %v1238_v21 }
 0xbf9   :  { %4457 = vrsqrt.f32 %v1239_v22 }
 0xc03   :  { %v4458_v26 = vpop.eup %4457 }
 0xc04   :  { %v1241_v27 = vmul.f32 %v4458_v26, %v1233_v14 }
 0xc06   :  { %v1246_v30 = vmul.f32 %v1245_v25, %v1241_v27 }
 0xc08   :  { %v1251_v31 = vadd.f32 %v1250_v28, %v1246_v30 }
 0xc0a   :  { %3911 = vmatmul.mubr.msk.f32.vlgmr.msra.gmra.mrb[2].mxu0 %vm154_vm1, %v1251_v31 }
 0xc0b   :  { %3915 = vmatprep.mubr.msk.f32.mxu0 %vm4498_vm2, %v4499_v52 }
 0xcdd   :  { %v1325_v33 = vpop.f32.mrb[2].mxu0 }
 0xcde   :  { %v4949_v35 = vadd.f32 %v1325_v33, %v1255_v32  ;;  %v3912_v36 = vpop.f32.mrb[3].mxu0 }
 0xce0   :  { %1408 = vrot.lane.b32.xlu1 %v4949_v35, %s4502_s8  ;;  %1330 = vrot.lane.b32.xlu0 %v4949_v35, %s4501_s7 }
 0xce4   :  { %1406 = vrot.lane.b32.xlu1 %v4949_v35, %s4500_s6  ;;  %1486 = vrot.lane.b32.xlu0 %v4949_v35, %s4503_s9 }
 0xce8   :  { %1484 = vrot.lane.b32.xlu1 %v4949_v35, %s4504_s10  ;;  %1564 = vrot.lane.b32.xlu0 %v4949_v35, %s4505_s11 }
 0xcec   :  { %1562 = vrot.lane.b32.xlu1 %v4949_v35, %s4506_s12 }
 0xd52   :  { %v1409_v37 = vpop.permute.xlu1 %1408  ;;  %v1331_v38 = vpop.permute.xlu0 %1330 }
 0xd53   :  { %3914 = vmatpush3.xpose.msk.msra.mxu0 %vm259_vm3, %v1331_v38 }
 0xd54   :  { %3918 = vmatprep.subr.mxu0 %v4499_v52 }
 0xd56   :  { %v1407_v39 = vpop.permute.xlu1 %1406  ;;  %3916 = vmatmul.mubr.msk.f32.vlgmr.msra.gmra.mrb[4].mxu0 %vm259_vm3, %v4949_v35  ;;  %v1487_v40 = vpop.permute.xlu0 %1486 }
 0xd57   :  { %3919 = vmatpush3.xpose.msk.msra.mxu0 %vm259_vm3, %v1409_v37  ;;  %3920 = vmatprep.mubr.msk.f32.mxu0 %vm4498_vm2, %v4499_v52 }
 0xd58   :  { %3923 = vmatprep.subr.mxu0 %v4499_v52 }
 0xd5a   :  { %3921 = vmatmul.mubr.msk.f32.vlgmr.msra.gmra.mrb[6].mxu0 %vm259_vm3, %v1407_v39  ;;  %v1485_v42 = vpop.permute.xlu1 %1484  ;;  %v1565_v43 = vpop.permute.xlu0 %1564 }
 0xd5b   :  { %3924 = vmatpush3.xpose.msk.msra.mxu0 %vm259_vm3, %v1487_v40  ;;  %3925 = vmatprep.mubr.msk.f32.mxu0 %vm4498_vm2, %v4499_v52 }
 0xd5c   :  { %3928 = vmatprep.subr.mxu0 %v4499_v52 }
 0xd5e   :  { %3926 = vmatmul.mubr.msk.f32.vlgmr.msra.gmra.mrb[8].mxu0 %vm259_vm3, %v1485_v42  ;;  %v1563_v46 = vpop.permute.xlu1 %1562 }
 0xd5f   :  { %3929 = vmatpush3.xpose.msk.msra.mxu0 %vm259_vm3, %v1565_v43  ;;  %3930 = vmatprep.mubr.msk.f32.mxu0 %vm4498_vm2, %v4499_v52 }
 0xd60   :  { %3933 = vmatprep.subr.mxu0 %v4499_v52 }
 0xd62   :  { %3931 = vmatmul.mubr.msk.f32.vlgmr.msra.gmra.mrb[10].mxu0 %vm259_vm3, %v1563_v46 }
 0xd63   :  { %3935 = vmatprep.mubr.msk.f32.mxu0 %vm4498_vm2, %v4499_v52 }
 0xe29   :  { %v1402_v47 = vpop.f32.mrb[4].mxu0 }
 0xe2a   :  { %v1640_v48 = vadd.f32 %v1402_v47, %v4731_v19  ;;  %v3917_v50 = vpop.f32.mrb[5].mxu0  ;;  %v1205_v47 = vld [vmem:[%s5427_s1 + $0x160] sm:$0xff] }
 0xe2c   :  { %v1644_v51 = vsel %vm259_vm3, %v1640_v48, -inf }
 0xe2d   :  { %1645 = vmax.xlane.f32.xlu0 %v1644_v51  ;;  %v1480_v53 = vpop.f32.mrb[6].mxu0  ;;  %v1207_v51 = vld [vmem:[%s5427_s1 + $0x170] sm:$0xff] }
 0xe2e   :  { %v1641_v54 = vadd.f32 %v1480_v53, %v4737_v23  ;;  %v3922_v55 = vpop.f32.mrb[7].mxu0  ;;  %v1208_v53 = vld [vmem:[%s5427_s1 + $0x178] sm:$0xff] }
 0xe30   :  { %v1647_v56 = vsel %vm259_vm3, %v1641_v54, -inf }
 0xe31   :  { %1648 = vmax.xlane.f32.xlu1 %v1647_v56  ;;  %v1558_v57 = vpop.f32.mrb[8].mxu0 }
 0xe32   :  { %v1642_v41 = vadd.f32 %v1558_v57, %v4745_v29  ;;  %v3927_v58 = vpop.f32.mrb[9].mxu0 }
 0xe34   :  { %v1650_v59 = vsel %vm259_vm3, %v1642_v41, -inf }
 0xe35   :  { %1651 = vmax.xlane.f32.xlu0 %v1650_v59  ;;  %v1636_v2 = vpop.f32.mrb[10].mxu0 }
 0xe36   :  { %v1643_v19 = vadd.f32 %v1636_v2, %v4752_v34  ;;  %v3932_v3 = vpop.f32.mrb[11].mxu0 }
 0xe38   :  { %v1653_v4 = vsel %vm259_vm3, %v1643_v19, -inf }
 0xe39   :  { %1654 = vmax.xlane.f32.xlu0 %v1653_v4 }
 0xe42   :  { %1688 = vrot.lane.b32.xlu1 %v4949_v35, %s4507_s21 }
 0xeba   :  { %v1646_v23 = vpop.xlane.xlu0 %1645 }
 0xebb   :  { %v1656_v5 = vsub.f32 %v1640_v48, %v1646_v23  ;;  %v1206_v48 = vld [vmem:[%s5427_s1 + $0x168] sm:$0xff] }
 0xebc   :  { %v4249_v50 = vpack.c.bf16 %v1206_v48, %v1205_v47  ;;  %v1218_v47 = vld [vmem:[%s5427_s1 + $0x1a8] sm:$0xff] }
 0xebd   :  { %v1660_v11 = vmul.f32 1.442695, %v1656_v5 }
 0xebe   :  { %v1649_v12 = vpop.xlane.xlu1 %1648 }
 0xebf   :  { %4459 = vpow2.f32 %v1660_v11  ;;  %v1657_v29 = vsub.f32 %v1641_v54, %v1649_v12  ;;  %v4252_v54 = vpack.c.bf16 %v1208_v53, %v1207_v51  ;;  %v1220_v51 = vld [vmem:[%s5427_s1 + $0x1b8] sm:$0xff] }
 0xec1   :  { %v1662_v13 = vmul.f32 1.442695, %v1657_v29  ;;  %v2010_v29 = vrot.slane %v4938_v24, %v4808_v44 }
 0xec2   :  { %v1689_v14 = vpop.permute.xlu1 %1688  ;;  %v1652_v10 = vpop.xlane.xlu0 %1651 }
 0xec3   :  { %4461 = vpow2.f32 %v1662_v13  ;;  %v1658_v60 = vsub.f32 %v1642_v41, %v1652_v10  ;;  %3934 = vmatpush3.msra.mxu0 %v1689_v14 }
 0xec4   :  { %3943 = vmatprep.subr.mxu0 %v4499_v52 }
 0xec5   :  { %v1664_v34 = vmul.f32 1.442695, %v1658_v60 }
 0xec6   :  { %v1655_v62 = vpop.xlane.xlu0 %1654 }
 0xec7   :  { %4463 = vpow2.f32 %v1664_v34  ;;  %v1659_v49 = vsub.f32 %v1643_v19, %v1655_v62 }
 0xec9   :  { %v4460_v15 = vpop.eup %4459  ;;  %v1666_v16 = vmul.f32 1.442695, %v1659_v49 }
 0xeca   :  { %v1668_v17 = vsel %vm259_vm3, %v4460_v15, 0.0 }
 0xecb   :  { %4465 = vpow2.f32 %v1666_v16  ;;  %1669 = vadd.xlane.f32.xlu1 %v1668_v17 }
 0xecd   :  { %v4462_v18 = vpop.eup %4461 }
 0xece   :  { %v1671_v20 = vsel %vm259_vm3, %v4462_v18, 0.0 }
 0xecf   :  { %1672 = vadd.xlane.f32.xlu0 %v1671_v20 }
 0xed1   :  { %v4464_v21 = vpop.eup %4463 }
 0xed2   :  { %v1674_v22 = vsel %vm259_vm3, %v4464_v21, 0.0 }
 0xed3   :  { %1675 = vadd.xlane.f32.xlu1 %v1674_v22  ;;  %v1212_v22 = vld [vmem:[%s5431_s3 + $0x38] sm:$0xff] }
 0xed5   :  { %v4466_v25 = vpop.eup %4465 }
 0xed6   :  { %v1677_v26 = vsel %vm259_vm3, %v4466_v25, 0.0 }
 0xed7   :  { %1678 = vadd.xlane.f32.xlu0 %v1677_v26  ;;  %v1213_v26 = vld [vmem:[%s5427_s1 + $0x180] sm:$0xff] }
 0xee4   :  { %1840 = vrot.lane.b32.xlu1 %v4949_v35, %s4508_s0 }
 0xee8   :  { %1916 = vrot.lane.b32.xlu1 %v4949_v35, %s4509_s22 }
 0xeed   :  { %1764 = vrot.lane.b32.xlu0 %v4949_v35, %s4510_s23 }
 0xf58   :  { %v1670_v27 = vpop.xlane.xlu1 %1669 }
 0xf59   :  { %4467 = vrcp.f32 %v1670_v27  ;;  %v1214_v27 = vld [vmem:[%s5427_s1 + $0x188] sm:$0xff] }
 0xf5c   :  { %v1673_v28 = vpop.xlane.xlu0 %1672 }
 0xf5d   :  { %4469 = vrcp.f32 %v1673_v28  ;;  %v4261_v28 = vpack.c.bf16 %v1214_v27, %v1213_v26  ;;  %v2268_v27 = vrot.slane %v4938_v24, %v4910_v1 }
 0xf60   :  { %v1676_v30 = vpop.xlane.xlu1 %1675 }
 0xf61   :  { %4471 = vrcp.f32 %v1676_v30 }
 0xf63   :  { %v4468_v31 = vpop.eup %4467 }
 0xf64   :  { %v1684_v32 = vmul.f32 %v4468_v31, %v4460_v15  ;;  %v1841_v33 = vpop.permute.xlu1 %1840  ;;  %v1679_v36 = vpop.xlane.xlu0 %1678 }
 0xf65   :  { %4473 = vrcp.f32 %v1679_v36 }
 0xf66   :  { %3936 = vmatmul.mubr.msk.f32.vlgmr.msra.gmra.mrb[12].mxu0 %vm259_vm3, %v1684_v32 }
 0xf67   :  { %v4470_v37 = vpop.eup %4469  ;;  %3944 = vmatpush3.msra.mxu0 %v1841_v33  ;;  %3945 = vmatprep.mubr.msk.f32.mxu0 %vm4498_vm2, %v4499_v52  ;;  %v2101_v33 = vrot.slane %v4938_v24, %v4834_v6 }
 0xf68   :  { %v1685_v38 = vmul.f32 %v4470_v37, %v4462_v18  ;;  %v1765_v35 = vpop.permute.xlu0 %1764  ;;  %4248 = vmatprep.subr.bf16.mxu0 %v4497_v0  ;;  %v1917_v39 = vpop.permute.xlu1 %1916  ;;  %v1209_v18 = vld [vmem:[%s5431_s3 + $0x20] sm:$0xff] }
 0xf69   :  { %3939 = vmatpush3.msra.mxu1 %v1765_v35 }
 0xf6a   :  { %3941 = vmatmul.mubr.msk.f32.vlgmr.msra.gmra.mrb[24].mxu1 %vm259_vm3, %v1685_v38  ;;  %3948 = vmatprep.subr.mxu1 %v4499_v52  ;;  %v2106_v38 = vrot.slane %v4938_v24, %v4837_v8 }
 0xf6b   :  { %v4472_v40 = vpop.eup %4471  ;;  %3949 = vmatpush3.msra.mxu1 %v1917_v39  ;;  %3950 = vmatprep.mubr.msk.f32.mxu1 %vm4498_vm2, %v4499_v52 }
 0xf6c   :  { %v1686_v42 = vmul.f32 %v4472_v40, %v4464_v21  ;;  %4254 = vmatprep.subr.bf16.mxu1 %v4497_v0  ;;  %v1211_v21 = vld [vmem:[%s5431_s3 + $0x30] sm:$0xff] }
 0xf6d   :  { %v1215_v40 = vld [vmem:[%s5427_s1 + $0x190] sm:$0xff] }
 0xf6e   :  { %3946 = vmatmul.mubr.msk.f32.vlgmr.msra.gmra.mrb[14].mxu0 %vm259_vm3, %v1686_v42  ;;  %v1216_v42 = vld [vmem:[%s5427_s1 + $0x198] sm:$0xff] }
 0xf6f   :  { %v4474_v43 = vpop.eup %4473  ;;  %3961 = vmatprep.mubr.msk.f32.mxu0 %vm4498_vm2, %v4499_v52  ;;  %4250 = vmatpush3.bf16.msra.mxu0 %v4249_v50  ;;  %v1219_v50 = vld [vmem:[%s5427_s1 + $0x1b0] sm:$0xff] }
 0xf70   :  { %v1687_v46 = vmul.f32 %v4474_v43, %v4466_v25  ;;  %4251 = vmatprep.subr.bf16.mxu0 %v4497_v0  ;;  %v4258_v25 = vpack.c.bf16 %v1212_v22, %v1211_v21  ;;  %v4264_v43 = vpack.c.bf16 %v1216_v42, %v1215_v40  ;;  %v4270_v53 = vpack.c.bf16 %v1220_v51, %v1219_v50  ;;  %v2271_v40 = vld [vmem:[%s5430_s2 + $0x40] sm:$0xff]  ;;  %v2273_v42 = vld [vmem:[%s5430_s2 + $0x50] sm:$0xff] }
 0xf72   :  { %3951 = vmatmul.mubr.msk.f32.vlgmr.msra.gmra.mrb[26].mxu1 %vm259_vm3, %v1687_v46  ;;  %v1217_v46 = vld [vmem:[%s5427_s1 + $0x1a0] sm:$0xff] }
 0xf73   :  { %3972 = vmatprep.mubr.msk.f32.mxu1 %vm4498_vm2, %v4499_v52  ;;  %4253 = vmatpush3.bf16.msra.mxu0 %v4252_v54  ;;  %v4267_v48 = vpack.c.bf16 %v1218_v47, %v1217_v46  ;;  %v1221_v54 = vld [vmem:[%s5427_s1 + $0x1c0] sm:$0xff] }
 0xf74   :  { %4260 = vmatprep.subr.bf16.mxu0 %v4497_v0 }
0x1039   :  { %v1760_v55 = vpop.f32.mrb[12].mxu0 }
0x103a   :  { %v3937_v56 = vpop.f32.mrb[13].mxu0 }
0x103b   :  { %v1223_v56 = vld [vmem:[%s5427_s1 + $0x1d0] sm:$0xff] }
0x103d   :  { %v1836_v57 = vpop.f32.mrb[24].mxu1 }
0x103e   :  { %1993 = vrot.lane.b32.xlu0 %v1836_v57, %s4511_s14  ;;  %v3942_v41 = vpop.f32.mrb[25].mxu1 }
0x103f   :  { %v1224_v41 = vld [vmem:[%s5427_s1 + $0x1d8] sm:$0xff] }
0x1041   :  { %v1912_v58 = vpop.f32.mrb[14].mxu0 }
0x1042   :  { %1997 = vrot.lane.b32.xlu1 %v1912_v58, %s4512_s15  ;;  %v3947_v59 = vpop.f32.mrb[15].mxu0  ;;  %v4276_v58 = vpack.c.bf16 %v1224_v41, %v1223_v56 }
0x1043   :  { %v1225_v59 = vld [vmem:[%s5427_s1 + $0x1e0] sm:$0xff] }
0x1045   :  { %v1988_v2 = vpop.f32.mrb[26].mxu1 }
0x1046   :  { %2001 = vrot.lane.b32.xlu0 %v1988_v2, %s4513_s16  ;;  %v3952_v19 = vpop.f32.mrb[27].mxu1  ;;  %v1226_v2 = vld [vmem:[%s5427_s1 + $0x1e8] sm:$0xff] }
0x1047   :  { %v4279_v19 = vpack.c.bf16 %v1226_v2, %v1225_v59 }
0x10b0   :  { %v1994_v3 = vpop.permute.xlu0 %1993 }
0x10b1   :  { %v2004_v23 = vsel %vm259_vm3, %v1760_v55, %v1994_v3  ;;  %v1222_v55 = vld [vmem:[%s5427_s1 + $0x1c8] sm:$0xff]  ;;  %v1227_v3 = vld [vmem:[%s5427_s1 + $0x1f0] sm:$0xff] }
0x10b2   :  { %v4273_v57 = vpack.c.bf16 %v1222_v55, %v1221_v54  ;;  %v5166_v55 = vld [vmem:[%s5429_s4 + $0x58] sm:$0xff] }
0x10b3   :  { %v2317_v41 = vrot.slane %v5166_v55, %v4669_v61  ;;  %v2322_v2 = vrot.slane %v5166_v55, %v4677_v63  ;;  %v2327_v63 = vrot.slane %v5166_v55, %v4687_v7 }
0x10b4   :  { %v1998_v4 = vpop.permute.xlu1 %1997 }
0x10b5   :  { %v2005_v5 = vsel %vm933_vm4, %v2004_v23, %v1998_v4  ;;  %v1228_v4 = vld [vmem:[%s5427_s1 + $0x1f8] sm:$0xff] }
0x10b6   :  { %v4282_v23 = vpack.c.bf16 %v1228_v4, %v1227_v3 }
0x10b8   :  { %v2002_v11 = vpop.permute.xlu0 %2001 }
0x10b9   :  { %v2006_v12 = vsel %vm935_vm5, %v2005_v5, %v2002_v11  ;;  %v5134_v5 = vld [vmem:[%s5429_s4 + $0x38] sm:$0xff] }
0x10ba   :  { %3962 = vmatmul.mubr.msk.f32.vlgmr.msra.gmra.mrb[16].mxu0 %vm154_vm1, %v2006_v12  ;;  %v2402_v11 = vsel %vm2401_vm6, %v5134_v5, 0.0  ;;  %v2111_v12 = vrot.slane %v4938_v24, %v4903_v45  ;;  %v2272_v24 = vld [vmem:[%s5430_s2 + $0x48] sm:$0xff] }
0x10bb   :  { %4007 = vmatprep.mubr.msk.f32.mxu0 %vm4498_vm2, %v4499_v52  ;;  %4262 = vmatpush3.bf16.msra.mxu0 %v4261_v28 }
0x10bc   :  { %4263 = vmatprep.subr.bf16.mxu0 %v4497_v0 }
0x10bf   :  { %4265 = vmatpush3.bf16.msra.mxu0 %v4264_v43  ;;  %v2274_v43 = vld [vmem:[%s5430_s2 + $0x58] sm:$0xff] }
0x10c0   :  { %4266 = vmatprep.subr.bf16.mxu0 %v4497_v0  ;;  %v4288_v46 = vpack.c.bf16 %v2274_v43, %v2273_v42  ;;  %v2495_v43 = vld [vmem:[%s5429_s4 + $0x28] sm:$0xff] }
0x10c3   :  { %4268 = vmatpush3.bf16.msra.mxu0 %v4267_v48 }
0x10c4   :  { %4269 = vmatprep.subr.bf16.mxu0 %v4497_v0 }
0x10c7   :  { %4271 = vmatpush3.bf16.msra.mxu0 %v4270_v53 }
0x10c8   :  { %4272 = vmatprep.subr.bf16.mxu0 %v4497_v0 }
0x10cb   :  { %4274 = vmatpush3.bf16.msra.mxu0 %v4273_v57 }
0x10cc   :  { %4275 = vmatprep.subr.bf16.mxu0 %v4497_v0 }
0x10cf   :  { %4277 = vmatpush3.bf16.msra.mxu0 %v4276_v58 }
0x10d0   :  { %4278 = vmatprep.subr.bf16.mxu0 %v4497_v0 }
0x10d3   :  { %4280 = vmatpush3.bf16.msra.mxu0 %v4279_v19 }
0x10d4   :  { %4281 = vmatprep.subr.bf16.mxu0 %v4497_v0 }
0x10d7   :  { %4283 = vmatpush3.bf16.msra.mxu0 %v4282_v23 }
0x10d8   :  { %4304 = vmatprep.subr.bf16.mxu0 %v4497_v0 }
0x118d   :  { %v2080_v13 = vpop.f32.mrb[16].mxu0 }
0x118e   :  { %v2081_v14 = vadd.f32 %v2080_v13, %v2010_v29  ;;  %v3963_v10 = vpop.f32.mrb[17].mxu0 }
0x1190   :  { %v5048_v60 = vadd.f32 %v2081_v14, %v4915_v9  ;;  %v1210_v9 = vld [vmem:[%s5431_s3 + $0x28] sm:$0xff] }
0x1191   :  { %v4255_v20 = vpack.c.bf16 %v1210_v9, %v1209_v18 }
0x1192   :  { %v2085_v34 = vsel %vm154_vm1, %v5048_v60, 0.0 }
0x1193   :  { %2086 = vadd.xlane.f32.xlu1 %v2085_v34  ;;  %4256 = vmatpush3.bf16.msra.mxu1 %v4255_v20 }
0x1194   :  { %4257 = vmatprep.subr.bf16.mxu1 %v4497_v0 }
0x1197   :  { %4259 = vmatpush3.bf16.msra.mxu1 %v4258_v25  ;;  %2403 = vadd.xlane.f32.xlu1 %v2402_v11 }
0x1198   :  { %4284 = vmatprep.subr.bf16.mxu1 %v4497_v0 }
0x1220   :  { %v2087_v62 = vpop.xlane.xlu1 %2086 }
0x1221   :  { %v2088_v49 = vmul.f32 0.03125, %v2087_v62 }
0x1223   :  { %v2089_v15 = vsub.f32 %v5048_v60, %v2088_v49 }
0x1224   :  { %v2404_v20 = vpop.xlane.xlu1 %2403 }
0x1225   :  { %v2090_v16 = vmul.f32 %v2089_v15, %v2089_v15  ;;  %v2405_v21 = vmul.f32 0.03125, %v2404_v20 }
0x1227   :  { %v2091_v17 = vsel %vm154_vm1, %v2090_v16, 0.0  ;;  %v2406_v22 = vsub.f32 %v5134_v5, %v2405_v21 }
0x1228   :  { %2092 = vadd.xlane.f32.xlu0 %v2091_v17 }
0x1229   :  { %v2407_v25 = vmul.f32 %v2406_v22, %v2406_v22 }
0x122b   :  { %v2408_v26 = vsel %vm2401_vm6, %v2407_v25, 0.0 }
0x122c   :  { %2409 = vadd.xlane.f32.xlu1 %v2408_v26 }
0x12b5   :  { %v2093_v30 = vpop.xlane.xlu0 %2092 }
0x12b6   :  { %v2094_v31 = vmul.f32 0.03125, %v2093_v30 }
0x12b8   :  { %v2095_v32 = vadd.f32 1e-05, %v2094_v31 }
0x12b9   :  { %v2410_v47 = vpop.xlane.xlu1 %2409 }
0x12ba   :  { %4475 = vrsqrt.f32 %v2095_v32  ;;  %v2411_v48 = vmul.f32 0.03125, %v2410_v47 }
0x12bc   :  { %v2412_v53 = vadd.f32 1e-05, %v2411_v48 }
0x12c4   :  { %v4476_v36 = vpop.eup %4475 }
0x12c5   :  { %v2097_v37 = vmul.f32 %v4476_v36, %v2089_v15 }
0x12c7   :  { %v2102_v35 = vmul.f32 %v2101_v33, %v2097_v37 }
0x12c9   :  { %v2107_v39 = vadd.f32 %v2106_v38, %v2102_v35 }
0x12cb   :  { %3973 = vmatmul.mubr.msk.f32.vlgmr.msra.gmra.mrb[28].mxu1 %vm154_vm1, %v2107_v39 }
0x12cc   :  { %4018 = vmatprep.mubr.msk.f32.mxu1 %vm4498_vm2, %v4499_v52 }
0x139e   :  { %v2181_v29 = vpop.f32.mrb[28].mxu1 }
0x139f   :  { %v2182_v13 = vadd.f32 %v2181_v29, %v2111_v12  ;;  %v3974_v14 = vpop.f32.mrb[29].mxu1 }
0x13a1   :  { %v2185_v10 = vmul.f32 %v2182_v13, %v2182_v13 }
0x13a3   :  { %v2186_v34 = vmul.f32 %v2185_v10, %v2182_v13 }
0x13a5   :  { %v2187_v62 = vmul.f32 0.044715, %v2186_v34 }
0x13a7   :  { %v2188_v49 = vadd.f32 %v2187_v62, %v2182_v13 }
0x13a9   :  { %v2189_v15 = vmul.f32 0.7978846, %v2188_v49 }
0x13ab   :  { %4477 = vtanh.f32 %v2189_v15 }
0x13b5   :  { %v4478_v16 = vpop.eup %4477 }
0x13b6   :  { %v2191_v17 = vadd.f32 1.0, %v4478_v16 }
0x13b8   :  { %v2192_v18 = vmul.f32 0.5, %v2191_v17 }
0x13ba   :  { %v2193_v9 = vmul.f32 %v2192_v18, %v2182_v13 }
0x13bc   :  { %4008 = vmatmul.mubr.f32.vlgmr.msra.gmra.mrb[18].mxu0 %v2193_v9 }
0x13bd   :  { %4050 = vmatprep.mubr.msk.f32.mxu0 %vm4498_vm2, %v4499_v52 }
0x148f   :  { %v2260_v28 = vpop.f32.mrb[18].mxu0 }
0x1490   :  { %v2264_v30 = vadd.f32 %v2260_v28, %v5048_v60  ;;  %v4009_v31 = vpop.f32.mrb[19].mxu0  ;;  %v4285_v60 = vpack.c.bf16 %v2272_v24, %v2271_v40 }
0x1492   :  { %v2269_v32 = vadd.f32 %v2268_v27, %v2264_v30  ;;  %4286 = vmatpush3.bf16.msra.mxu1 %v4285_v60 }
0x1493   :  { %4287 = vmatprep.subr.bf16.mxu1 %v4497_v0 }
0x1494   :  { %v2301_v33 = vsel %vm154_vm1, %v2269_v32, 0.0 }
0x1495   :  { %2302 = vadd.xlane.f32.xlu0 %v2301_v33 }
0x1496   :  { %4289 = vmatpush3.bf16.msra.mxu1 %v4288_v46 }
0x1497   :  { %4290 = vmatprep.subr.bf16.mxu1 %v4497_v0 }
0x1522   :  { %v2303_v36 = vpop.xlane.xlu0 %2302 }
0x1523   :  { %v2304_v37 = vmul.f32 0.03125, %v2303_v36 }
0x1525   :  { %v2305_v38 = vsub.f32 %v2269_v32, %v2304_v37 }
0x1527   :  { %v2306_v35 = vmul.f32 %v2305_v38, %v2305_v38 }
0x1529   :  { %v2307_v39 = vsel %vm154_vm1, %v2306_v35, 0.0 }
0x152a   :  { %2308 = vadd.xlane.f32.xlu0 %v2307_v39 }
0x15b7   :  { %v2309_v50 = vpop.xlane.xlu0 %2308 }
0x15b8   :  { %v2310_v51 = vmul.f32 0.03125, %v2309_v50 }
0x15ba   :  { %v2311_v54 = vadd.f32 1e-05, %v2310_v51 }
0x15bc   :  { %4479 = vrsqrt.f32 %v2311_v54  ;;  %v2496_v54 = vld [vmem:[%s5429_s4 + $0x30] sm:$0xff] }
0x15bd   :  { %4481 = vrsqrt.f32 %v2412_v53 }
0x15c6   :  { %v4480_v56 = vpop.eup %4479 }
0x15c7   :  { %v2313_v57 = vmul.f32 %v4480_v56, %v2305_v38  ;;  %v4482_v58 = vpop.eup %4481 }
0x15c8   :  { %v2414_v19 = vmul.f32 %v4482_v58, %v2406_v22 }
0x15c9   :  { %v2318_v59 = vmul.f32 %v2317_v41, %v2313_v57 }
0x15ca   :  { %v2415_v4 = vmul.f32 %v2414_v19, %v2317_v41 }
0x15cb   :  { %v2323_v3 = vadd.f32 %v2322_v2, %v2318_v59 }
0x15cc   :  { %v2416_v23 = vadd.f32 %v2415_v4, %v2322_v2 }
0x15cd   :  { %4019 = vmatmul.mubr.msk.f32.vlgmr.msra.gmra.mrb[30].mxu1 %vm154_vm1, %v2323_v3 }
0x15ce   :  { %4292 = vmatpush3.bf16.msra.mxu1 %v4285_v60  ;;  %4029 = vmatprep.mubr.msk.f32.mxu1 %vm4498_vm2, %v4499_v52 }
0x15cf   :  { %4293 = vmatprep.subr.bf16.mxu1 %v4497_v0 }
0x15d2   :  { %4295 = vmatpush3.bf16.msra.mxu1 %v4288_v46 }
0x15d3   :  { %4296 = vmatprep.subr.bf16.mxu1 %v4497_v0 }
0x15d5   :  { %4030 = vmatmul.mubr.msk.f32.vlgmr.msra.gmra.mrb[32].mxu1 %vm154_vm1, %v2416_v23 }
0x15d6   :  { %4036 = vmatprep.mubr.msk.f32.mxu1 %vm4498_vm2, %v4499_v52 }
0x16a0   :  { %v2397_v61 = vpop.f32.mrb[30].mxu1 }
0x16a1   :  { %v4020_v11 = vpop.f32.mrb[31].mxu1  ;;  %v2398_v12 = vadd.f32 %v2397_v61, %v2327_v63 }
0x16a3   :  { %v2491_v13 = vrot.slane %v2398_v12, 4 }
0x16a8   :  { %v2486_v29 = vpop.f32.mrb[32].mxu1 }
0x16a9   :  { %v2487_v14 = vadd.f32 %v2486_v29, %v2327_v63  ;;  %v4031_v10 = vpop.f32.mrb[33].mxu1 }
0x16ab   :  { %v2494_v34 = vsel %vm2493_vm7, %v2487_v14, %v2491_v13 }
0x16ac   :  { %v5183_v62 = vpack.i.bf16 %v2491_v13, %v2494_v34 }
0x16ae   :  { %4401 = vrot.lane.b32.xlu1 %v5183_v62, %s4502_s8  ;;  %4396 = vrot.lane.b32.xlu0 %v5183_v62, %s4501_s7 }
0x16b2   :  { %4406 = vrot.lane.b32.xlu1 %v5183_v62, %s4505_s11  ;;  %2579 = vrot.lane.b32.xlu0 %v2487_v14, %s4500_s6 }
0x16b6   :  { %4411 = vrot.lane.b32.xlu1 %v5183_v62, %s4503_s9  ;;  %2743 = vrot.lane.b32.xlu0 %v2487_v14, %s4506_s12 }
0x16ba   :  { %2661 = vrot.lane.b32.xlu1 %v2487_v14, %s4504_s10 }
0x1720   :  { %v4402_v7 = vpop.permute.xlu1 %4401  ;;  %v4397_v49 = vpop.permute.xlu0 %4396 }
0x1721   :  { %v4399_v15 = vunpack.i.h.bf16 %v4397_v49  ;;  %v4398_v16 = vunpack.i.l.bf16 %v4397_v49  ;;  %v4404_v20 = vunpack.i.h.bf16 %v4402_v7  ;;  %v4403_v21 = vunpack.i.l.bf16 %v4402_v7 }
0x1723   :  { %v4297_v18 = vpack.c.bf16 %v4399_v15, %v4398_v16  ;;  %v4301_v27 = vpack.c.bf16 %v4404_v20, %v4403_v21 }
0x1724   :  { %v4407_v9 = vpop.permute.xlu1 %4406  ;;  %v2580_v33 = vpop.permute.xlu0 %2579 }
0x1725   :  { %4299 = vmatpush3.bf16.xpose.msk.msra.mxu1 %vm5198_vm8, %v4297_v18  ;;  %v4409_v30 = vunpack.i.h.bf16 %v4407_v9  ;;  %v4408_v31 = vunpack.i.l.bf16 %v4407_v9 }
0x1726   :  { %4300 = vmatprep.subr.bf16.mxu1 %v4497_v0 }
0x1727   :  { %v4309_v32 = vpack.c.bf16 %v4409_v30, %v4408_v31 }
0x1728   :  { %v4412_v22 = vpop.permute.xlu1 %4411  ;;  %v2744_v37 = vpop.permute.xlu0 %2743 }
0x1729   :  { %v4414_v25 = vunpack.i.h.bf16 %v4412_v22  ;;  %v4413_v26 = vunpack.i.l.bf16 %v4412_v22 }
0x172b   :  { %v4305_v28 = vpack.c.bf16 %v4414_v25, %v4413_v26 }
0x172c   :  { %4037 = vmatmul.mubr.msk.f32.vlgmr.msra.gmra.mrb[34].mxu1 %vm259_vm3, %v2487_v14  ;;  %v2662_v36 = vpop.permute.xlu1 %2661 }
0x172d   :  { %4303 = vmatpush3.bf16.xpose.msk.msra.mxu1 %vm5198_vm8, %v4301_v27  ;;  %4307 = vmatpush3.bf16.xpose.msk.msra.mxu0 %vm5198_vm8, %v4305_v28 }
0x172e   :  { %4043 = vmatprep.mubr.msk.f32.mxu1 %vm4498_vm2, %v4499_v52  ;;  %4308 = vmatprep.subr.bf16.mxu1 %v4497_v0 }
0x172f   :  { %4312 = vmatprep.subr.bf16.mxu0 %v4497_v0 }
0x1734   :  { %4044 = vmatmul.mubr.msk.f32.vlgmr.msra.gmra.mrb[36].mxu1 %vm259_vm3, %v2580_v33  ;;  %4051 = vmatmul.mubr.msk.f32.vlgmr.msra.gmra.mrb[20].mxu0 %vm259_vm3, %v2662_v36  ;;  %v2275_v36 = vld [vmem:[%s5427_s1 + $0x200] sm:$0xff] }
0x1735   :  { %4311 = vmatpush3.bf16.xpose.msk.msra.mxu1 %vm5198_vm8, %v4309_v32  ;;  %4057 = vmatprep.mubr.msk.f32.mxu1 %vm4498_vm2, %v4499_v52 }
0x1736   :  { %4064 = vmatprep.mubr.msk.f32.mxu0 %vm4498_vm2, %v4499_v52  ;;  %4316 = vmatprep.subr.bf16.mxu1 %v4497_v0 }
0x173c   :  { %4058 = vmatmul.mubr.msk.f32.vlgmr.msra.gmra.mrb[38].mxu1 %vm259_vm3, %v2744_v37  ;;  %v2276_v37 = vld [vmem:[%s5427_s1 + $0x208] sm:$0xff] }
0x173d   :  { %4071 = vmatprep.mubr.msk.f32.mxu1 %vm4498_vm2, %v4499_v52 }
0x17ff   :  { %v2575_v38 = vpop.f32.mrb[34].mxu1 }
0x1800   :  { %v4038_v35 = vpop.f32.mrb[35].mxu1 }
0x1801   :  { %v2277_v35 = vld [vmem:[%s5427_s1 + $0x210] sm:$0xff] }
0x1807   :  { %v2657_v39 = vpop.f32.mrb[36].mxu1  ;;  %v2739_v40 = vpop.f32.mrb[20].mxu0 }
0x1808   :  { %v2826_v24 = vrot.slane %v2657_v39, 4  ;;  %v4045_v60 = vpop.f32.mrb[37].mxu1  ;;  %v4052_v42 = vpop.f32.mrb[21].mxu0  ;;  %v2278_v39 = vld [vmem:[%s5427_s1 + $0x218] sm:$0xff] }
0x180a   :  { %v2831_v46 = vsel %vm2493_vm7, %v2575_v38, %v2826_v24  ;;  %v4329_v38 = vpack.c.bf16 %v2276_v37, %v2275_v36  ;;  %v2291_v36 = vld [vmem:[%s5427_s1 + $0x260] sm:$0xff]  ;;  %v2292_v37 = vld [vmem:[%s5427_s1 + $0x268] sm:$0xff] }
0x180b   :  { %v2833_v47 = vadd.f32 %v2831_v46, %v2495_v43 }
0x180d   :  { %v2836_v48 = vsel %vm2835_vm9, %v2833_v47, -inf }
0x180e   :  { %2837 = vmax.xlane.f32.xlu0 %v2836_v48 }
0x180f   :  { %v2821_v50 = vpop.f32.mrb[38].mxu1 }
0x1810   :  { %v2829_v51 = vrot.slane %v2821_v50, 4  ;;  %v4059_v53 = vpop.f32.mrb[39].mxu1 }
0x1812   :  { %v2832_v56 = vsel %vm2493_vm7, %v2739_v40, %v2829_v51  ;;  %v4332_v40 = vpack.c.bf16 %v2278_v39, %v2277_v35  ;;  %v4353_v35 = vpack.c.bf16 %v2292_v37, %v2291_v36  ;;  %v2294_v39 = vld [vmem:[%s5427_s1 + $0x278] sm:$0xff] }
0x1813   :  { %v2834_v57 = vadd.f32 %v2832_v56, %v2496_v54 }
0x1815   :  { %v2839_v41 = vsel %vm2835_vm9, %v2834_v57, -inf }
0x1816   :  { %2840 = vmax.xlane.f32.xlu1 %v2839_v41 }
0x1827   :  { %4416 = vrot.lane.b32.xlu1 %v5183_v62, %s4507_s21 }
0x182b   :  { %4426 = vrot.lane.b32.xlu1 %v5183_v62, %s4508_s0 }
0x182f   :  { %4431 = vrot.lane.b32.xlu1 %v5183_v62, %s4509_s22 }
0x189b   :  { %v2838_v58 = vpop.xlane.xlu0 %2837 }
0x189c   :  { %v2842_v59 = vsub.f32 %v2833_v47, %v2838_v58  ;;  %v3196_v58 = vrot.slane %v5166_v55, %v4808_v44  ;;  %v2279_v44 = vld [vmem:[%s5431_s3 + $0x40] sm:$0xff] }
0x189e   :  { %v2844_v2 = vmul.f32 1.442695, %v2842_v59 }
0x18a0   :  { %4483 = vpow2.f32 %v2844_v2 }
0x18a3   :  { %v2841_v19 = vpop.xlane.xlu1 %2840 }
0x18a4   :  { %v2843_v3 = vsub.f32 %v2834_v57, %v2841_v19 }
0x18a6   :  { %v2846_v4 = vmul.f32 1.442695, %v2843_v3 }
0x18a7   :  { %v4417_v23 = vpop.permute.xlu1 %4416 }
0x18a8   :  { %4485 = vpow2.f32 %v2846_v4  ;;  %v4419_v61 = vunpack.i.h.bf16 %v4417_v23  ;;  %v4418_v63 = vunpack.i.l.bf16 %v4417_v23 }
0x18aa   :  { %v4484_v12 = vpop.eup %4483  ;;  %v4313_v29 = vpack.c.bf16 %v4419_v61, %v4418_v63 }
0x18ab   :  { %v2848_v13 = vsel %vm2835_vm9, %v4484_v12, 0.0  ;;  %v4427_v7 = vpop.permute.xlu1 %4426 }
0x18ac   :  { %2849 = vadd.xlane.f32.xlu0 %v2848_v13  ;;  %4315 = vmatpush3.bf16.msk.msra.mxu0 %vm5243_vm11, %v4313_v29  ;;  %v4429_v15 = vunpack.i.h.bf16 %v4427_v7  ;;  %v4428_v16 = vunpack.i.l.bf16 %v4427_v7  ;;  %v2280_v29 = vld [vmem:[%s5431_s3 + $0x48] sm:$0xff]  ;;  %v2283_v7 = vld [vmem:[%s5427_s1 + $0x220] sm:$0xff] }
0x18ad   :  { %4320 = vmatprep.subr.bf16.mxu0 %v4497_v0  ;;  %v4335_v13 = vpack.c.bf16 %v2280_v29, %v2279_v44 }
0x18ae   :  { %v4321_v21 = vpack.c.bf16 %v4429_v15, %v4428_v16 }
0x18af   :  { %v4432_v18 = vpop.permute.xlu1 %4431 }
0x18b0   :  { %v4434_v26 = vunpack.i.h.bf16 %v4432_v18  ;;  %v4433_v27 = vunpack.i.l.bf16 %v4432_v18 }
0x18b2   :  { %v4486_v14 = vpop.eup %4485  ;;  %v4325_v31 = vpack.c.bf16 %v4434_v26, %v4433_v27  ;;  %v2285_v27 = vld [vmem:[%s5427_s1 + $0x230] sm:$0xff] }
0x18b3   :  { %v2851_v10 = vsel %vm2835_vm9, %v4486_v14, 0.0 }
0x18b4   :  { %2852 = vadd.xlane.f32.xlu0 %v2851_v10  ;;  %v2282_v10 = vld [vmem:[%s5431_s3 + $0x58] sm:$0xff] }
0x18ca   :  { %4421 = vrot.lane.b32.xlu0 %v5183_v62, %s4510_s23 }
0x1939   :  { %v2850_v34 = vpop.xlane.xlu0 %2849 }
0x193a   :  { %4487 = vrcp.f32 %v2850_v34 }
0x1941   :  { %v2853_v49 = vpop.xlane.xlu0 %2852 }
0x1942   :  { %4489 = vrcp.f32 %v2853_v49  ;;  %v2284_v49 = vld [vmem:[%s5427_s1 + $0x228] sm:$0xff] }
0x1943   :  { %v4341_v15 = vpack.c.bf16 %v2284_v49, %v2283_v7  ;;  %v3483_v7 = vld [vmem:[%s5431_s3 + $0x78] sm:$0xff] }
0x1944   :  { %v4488_v17 = vpop.eup %4487 }
0x1945   :  { %v2856_v9 = vmul.f32 %v4488_v17, %v4484_v12  ;;  %v4422_v20 = vpop.permute.xlu0 %4421 }
0x1946   :  { %v4424_v22 = vunpack.i.h.bf16 %v4422_v20  ;;  %v4423_v25 = vunpack.i.l.bf16 %v4422_v20 }
0x1947   :  { %4065 = vmatmul.mubr.msk.f32.vlgmr.msra.gmra.mrb[22].mxu0 %vm2835_vm9, %v2856_v9  ;;  %v2938_v62 = vrot.slane %v2856_v9, 4  ;;  %v3287_v9 = vrot.slane %v5166_v55, %v4834_v6 }
0x1948   :  { %v4317_v28 = vpack.c.bf16 %v4424_v22, %v4423_v25  ;;  %4323 = vmatpush3.bf16.msk.msra.mxu0 %vm5243_vm11, %v4321_v21  ;;  %4078 = vmatprep.mubr.msk.f32.mxu0 %vm4498_vm2, %v4499_v52  ;;  %v3292_v22 = vrot.slane %v5166_v55, %v4837_v8  ;;  %v2287_v8 = vld [vmem:[%s5427_s1 + $0x240] sm:$0xff] }
0x1949   :  { %4328 = vmatprep.subr.bf16.mxu0 %v4497_v0 }
0x194a   :  { %4319 = vmatpush3.bf16.msk.msra.mxu1 %vm5243_vm11, %v4317_v28  ;;  %v2286_v28 = vld [vmem:[%s5427_s1 + $0x238] sm:$0xff] }
0x194b   :  { %4324 = vmatprep.subr.bf16.mxu1 %v4497_v0 }
0x194c   :  { %v4490_v30 = vpop.eup %4489 }
0x194d   :  { %v2857_v32 = vmul.f32 %v4490_v30, %v4486_v14  ;;  %4072 = vmatmul.mubr.msk.f32.vlgmr.msra.gmra.mrb[40].mxu1 %vm2835_vm9, %v2938_v62  ;;  %v2281_v14 = vld [vmem:[%s5431_s3 + $0x50] sm:$0xff]  ;;  %v4344_v62 = vpack.c.bf16 %v2286_v28, %v2285_v27 }
0x194e   :  { %4327 = vmatpush3.bf16.msk.msra.mxu1 %vm5243_vm11, %v4325_v31  ;;  %4085 = vmatprep.mubr.msk.f32.mxu1 %vm4498_vm2, %v4499_v52  ;;  %v4338_v34 = vpack.c.bf16 %v2282_v10, %v2281_v14  ;;  %v2289_v31 = vld [vmem:[%s5427_s1 + $0x250] sm:$0xff] }
0x194f   :  { %4079 = vmatmul.mubr.msk.f32.vlgmr.msra.gmra.mrb[24].mxu0 %vm2835_vm9, %v2857_v32  ;;  %v3098_v33 = vrot.slane %v2857_v32, 4  ;;  %4334 = vmatprep.subr.bf16.mxu1 %v4497_v0  ;;  %v2290_v32 = vld [vmem:[%s5427_s1 + $0x258] sm:$0xff] }
0x1950   :  { %4096 = vmatprep.mubr.msk.f32.mxu0 %vm4498_vm2, %v4499_v52  ;;  %4330 = vmatpush3.bf16.msra.mxu0 %v4329_v38  ;;  %v2293_v38 = vld [vmem:[%s5427_s1 + $0x270] sm:$0xff] }
0x1951   :  { %4086 = vmatmul.mubr.msk.f32.vlgmr.msra.gmra.mrb[42].mxu1 %vm2835_vm9, %v3098_v33  ;;  %4331 = vmatprep.subr.bf16.mxu0 %v4497_v0  ;;  %v4350_v33 = vpack.c.bf16 %v2290_v32, %v2289_v31 }
0x1952   :  { %4107 = vmatprep.mubr.msk.f32.mxu1 %vm4498_vm2, %v4499_v52  ;;  %4336 = vmatpush3.bf16.msra.mxu1 %v4335_v13 }
0x1953   :  { %4337 = vmatprep.subr.bf16.mxu1 %v4497_v0 }
0x1954   :  { %4333 = vmatpush3.bf16.msra.mxu0 %v4332_v40  ;;  %v4356_v40 = vpack.c.bf16 %v2294_v39, %v2293_v38 }
0x1955   :  { %4340 = vmatprep.subr.bf16.mxu0 %v4497_v0 }
0x1956   :  { %4339 = vmatpush3.bf16.msra.mxu1 %v4338_v34  ;;  %v3480_v34 = vld [vmem:[%s5431_s3 + $0x60] sm:$0xff] }
0x1957   :  { %4364 = vmatprep.subr.bf16.mxu1 %v4497_v0 }
0x1a1a   :  { %v2934_v24 = vpop.f32.mrb[22].mxu0 }
0x1a1b   :  { %v4066_v60 = vpop.f32.mrb[23].mxu0 }
0x1a1c   :  { %v2296_v60 = vld [vmem:[%s5427_s1 + $0x288] sm:$0xff] }
0x1a20   :  { %v3014_v42 = vpop.f32.mrb[40].mxu1 }
0x1a21   :  { %3179 = vrot.lane.b32.xlu0 %v3014_v42, %s4511_s14  ;;  %v4073_v43 = vpop.f32.mrb[41].mxu1 }
0x1a22   :  { %v3094_v46 = vpop.f32.mrb[24].mxu0  ;;  %v2297_v43 = vld [vmem:[%s5427_s1 + $0x290] sm:$0xff] }
0x1a23   :  { %3183 = vrot.lane.b32.xlu1 %v3094_v46, %s4512_s15  ;;  %v4080_v47 = vpop.f32.mrb[25].mxu0  ;;  %v2298_v46 = vld [vmem:[%s5427_s1 + $0x298] sm:$0xff] }
0x1a24   :  { %v3174_v48 = vpop.f32.mrb[42].mxu1  ;;  %v4362_v47 = vpack.c.bf16 %v2298_v46, %v2297_v43 }
0x1a25   :  { %3187 = vrot.lane.b32.xlu0 %v3174_v48, %s4513_s16  ;;  %v4087_v50 = vpop.f32.mrb[43].mxu1  ;;  %v3297_v48 = vrot.slane %v5166_v55, %v4903_v45 }
0x1a93   :  { %v3180_v51 = vpop.permute.xlu0 %3179 }
0x1a94   :  { %v3190_v53 = vsel %vm259_vm3, %v2934_v24, %v3180_v51  ;;  %v2295_v24 = vld [vmem:[%s5427_s1 + $0x280] sm:$0xff] }
0x1a95   :  { %v3184_v54 = vpop.permute.xlu1 %3183  ;;  %v4359_v42 = vpack.c.bf16 %v2296_v60, %v2295_v24 }
0x1a96   :  { %v3191_v56 = vsel %vm933_vm4, %v3190_v53, %v3184_v54 }
0x1a97   :  { %v3188_v57 = vpop.permute.xlu0 %3187 }
0x1a98   :  { %v3192_v41 = vsel %vm935_vm5, %v3191_v56, %v3188_v57 }
0x1a99   :  { %4097 = vmatmul.mubr.msk.f32.vlgmr.msra.gmra.mrb[26].mxu0 %vm154_vm1, %v3192_v41 }
0x1a9a   :  { %4142 = vmatprep.mubr.msk.f32.mxu0 %vm4498_vm2, %v4499_v52  ;;  %4342 = vmatpush3.bf16.msra.mxu0 %v4341_v15  ;;  %v3484_v15 = vld [vmem:[%s5431_s3 + $0x80] sm:$0xff] }
0x1a9b   :  { %4343 = vmatprep.subr.bf16.mxu0 %v4497_v0 }
0x1a9e   :  { %4345 = vmatpush3.bf16.msra.mxu0 %v4344_v62  ;;  %v2300_v62 = vld [vmem:[%s5429_s4 + $0x40] sm:$0xff] }
0x1a9f   :  { %4346 = vmatprep.subr.bf16.mxu0 %v4497_v0  ;;  %v3491_v32 = vrot.slane %v2300_v62, %v4834_v6 }
0x1b6c   :  { %v3266_v59 = vpop.f32.mrb[26].mxu0 }
0x1b6d   :  { %v3267_v2 = vadd.f32 %v3266_v59, %v3196_v58  ;;  %v4098_v19 = vpop.f32.mrb[27].mxu0 }
0x1b6f   :  { %v5301_v3 = vadd.f32 %v3267_v2, %v5134_v5 }
0x1b71   :  { %v3271_v4 = vsel %vm2401_vm6, %v5301_v3, 0.0 }
0x1b72   :  { %3272 = vadd.xlane.f32.xlu1 %v3271_v4 }
0x1bff   :  { %v3273_v23 = vpop.xlane.xlu1 %3272 }
0x1c00   :  { %v3274_v61 = vmul.f32 0.03125, %v3273_v23  ;;  %v3454_v23 = vrot.slane %v5166_v55, %v4910_v1  ;;  %v3481_v1 = vld [vmem:[%s5431_s3 + $0x68] sm:$0xff]  ;;  %v3482_v55 = vld [vmem:[%s5431_s3 + $0x70] sm:$0xff] }
0x1c01   :  { %v4368_v49 = vpack.c.bf16 %v3483_v7, %v3482_v55 }
0x1c02   :  { %v3275_v63 = vsub.f32 %v5301_v3, %v3274_v61 }
0x1c04   :  { %v3276_v11 = vmul.f32 %v3275_v63, %v3275_v63 }
0x1c06   :  { %v3277_v12 = vsel %vm2401_vm6, %v3276_v11, 0.0 }
0x1c07   :  { %3278 = vadd.xlane.f32.xlu0 %v3277_v12 }
0x1c94   :  { %v3279_v16 = vpop.xlane.xlu0 %3278 }
0x1c95   :  { %v3280_v17 = vmul.f32 0.03125, %v3279_v16  ;;  %v3485_v16 = vld [vmem:[%s5431_s3 + $0x88] sm:$0xff] }
0x1c97   :  { %v3281_v18 = vadd.f32 1e-05, %v3280_v17  ;;  %v4371_v17 = vpack.c.bf16 %v3485_v16, %v3484_v15 }
0x1c99   :  { %4491 = vrsqrt.f32 %v3281_v18  ;;  %v3486_v18 = vld [vmem:[%s5431_s3 + $0x90] sm:$0xff] }
0x1ca3   :  { %v4492_v20 = vpop.eup %4491 }
0x1ca4   :  { %v3283_v21 = vmul.f32 %v4492_v20, %v3275_v63 }
0x1ca6   :  { %v3288_v25 = vmul.f32 %v3287_v9, %v3283_v21  ;;  %v3487_v9 = vld [vmem:[%s5431_s3 + $0x98] sm:$0xff]  ;;  %s4515_s3 = smov 32  }
0x1ca7   :  { %v4374_v20 = vpack.c.bf16 %v3487_v9, %v3486_v18 }
0x1ca8   :  { %v3293_v26 = vadd.f32 %v3292_v22, %v3288_v25 }
0x1caa   :  { %4108 = vmatmul.mubr.msk.f32.vlgmr.msra.gmra.mrb[44].mxu1 %vm154_vm1, %v3293_v26  ;;  %v3470_v26 = vrot.slane %v5134_v5, 4 }
0x1cab   :  { %4161 = vmatprep.mubr.msk.f32.mxu1 %vm4498_vm2, %v4499_v52  ;;  %v2288_v52 = vld [vmem:[%s5427_s1 + $0x248] sm:$0xff] }
0x1cac   :  { %v4347_v30 = vpack.c.bf16 %v2288_v52, %v2287_v8 }
0x1cae   :  { %4348 = vmatpush3.bf16.msra.mxu0 %v4347_v30 }
0x1caf   :  { %4349 = vmatprep.subr.bf16.mxu0 %v4497_v0 }
0x1cb2   :  { %4351 = vmatpush3.bf16.msra.mxu0 %v4350_v33 }
0x1cb3   :  { %4352 = vmatprep.subr.bf16.mxu0 %v4497_v0 }
0x1cb6   :  { %4354 = vmatpush3.bf16.msra.mxu0 %v4353_v35 }
0x1cb7   :  { %4355 = vmatprep.subr.bf16.mxu0 %v4497_v0 }
0x1cba   :  { %4357 = vmatpush3.bf16.msra.mxu0 %v4356_v40 }
0x1cbb   :  { %4358 = vmatprep.subr.bf16.mxu0 %v4497_v0 }
0x1cbe   :  { %4360 = vmatpush3.bf16.msra.mxu0 %v4359_v42 }
0x1cbf   :  { %4361 = vmatprep.subr.bf16.mxu0 %v4497_v0 }
0x1cc2   :  { %4363 = vmatpush3.bf16.msra.mxu0 %v4362_v47 }
0x1d7d   :  { %v3367_v50 = vpop.f32.mrb[44].mxu1 }
0x1d7e   :  { %v3368_v51 = vadd.f32 %v3367_v50, %v3297_v48  ;;  %v4109_v53 = vpop.f32.mrb[45].mxu1 }
0x1d80   :  { %v3371_v54 = vmul.f32 %v3368_v51, %v3368_v51 }
0x1d82   :  { %v3372_v56 = vmul.f32 %v3371_v54, %v3368_v51 }
0x1d84   :  { %v3373_v57 = vmul.f32 0.044715, %v3372_v56 }
0x1d86   :  { %v3374_v41 = vadd.f32 %v3373_v57, %v3368_v51 }
0x1d88   :  { %v3375_v58 = vmul.f32 0.7978846, %v3374_v41 }
0x1d8a   :  { %4493 = vtanh.f32 %v3375_v58 }
0x1d94   :  { %v4494_v59 = vpop.eup %4493 }
0x1d95   :  { %v3377_v2 = vadd.f32 1.0, %v4494_v59 }
0x1d97   :  { %v3378_v19 = vmul.f32 0.5, %v3377_v2 }
0x1d99   :  { %v3379_v4 = vmul.f32 %v3378_v19, %v3368_v51 }
0x1d9b   :  { %4143 = vmatmul.mubr.f32.vlgmr.msra.gmra.mrb[28].mxu0 %v3379_v4 }
0x1e6e   :  { %v3446_v61 = vpop.f32.mrb[28].mxu0 }
0x1e6f   :  { %v3450_v45 = vadd.f32 %v3446_v61, %v5301_v3  ;;  %v4144_v63 = vpop.f32.mrb[29].mxu0  ;;  %v4365_v3 = vpack.c.bf16 %v3481_v1, %v3480_v34 }
0x1e71   :  { %v3455_v11 = vadd.f32 %v3454_v23, %v3450_v45  ;;  %4366 = vmatpush3.bf16.msra.mxu1 %v4365_v3 }
0x1e72   :  { %4367 = vmatprep.subr.bf16.mxu1 %v4497_v0 }
0x1e73   :  { %v3456_v12 = vsel %vm2401_vm6, %v3455_v11, 0.0 }
0x1e74   :  { %3457 = vadd.xlane.f32.xlu0 %v3456_v12 }
0x1e75   :  { %4369 = vmatpush3.bf16.msra.mxu1 %v4368_v49 }
0x1e76   :  { %4370 = vmatprep.subr.bf16.mxu1 %v4497_v0 }
0x1e79   :  { %4372 = vmatpush3.bf16.msra.mxu1 %v4371_v17 }
0x1e7a   :  { %4373 = vmatprep.subr.bf16.mxu1 %v4497_v0 }
0x1e7d   :  { %4375 = vmatpush3.bf16.msra.mxu1 %v4374_v20 }
0x1f01   :  { %v3458_v44 = vpop.xlane.xlu0 %3457 }
0x1f02   :  { %v3459_v29 = vmul.f32 0.03125, %v3458_v44 }
0x1f04   :  { %v3460_v13 = vsub.f32 %v3455_v11, %v3459_v29 }
0x1f06   :  { %v3461_v14 = vmul.f32 %v3460_v13, %v3460_v13 }
0x1f08   :  { %v3462_v10 = vsel %vm2401_vm6, %v3461_v14, 0.0 }
0x1f09   :  { %3463 = vadd.xlane.f32.xlu1 %v3462_v10 }
0x1f96   :  { %v3464_v21 = vpop.xlane.xlu1 %3463 }
0x1f97   :  { %v3465_v22 = vmul.f32 0.03125, %v3464_v21 }
0x1f99   :  { %v3466_v25 = vadd.f32 1e-05, %v3465_v22 }
0x1f9b   :  { %4495 = vrsqrt.f32 %v3466_v25 }
0x1fa5   :  { %v4496_v27 = vpop.eup %4495 }
0x1fa6   :  { %v3468_v28 = vmul.f32 %v4496_v27, %v3460_v13 }
0x1fa8   :  { %v3472_v8 = vmul.f32 %v3470_v26, %v3468_v28 }
0x1faa   :  { %v3473_v52 = vadd.f32 %v3472_v8, %v2300_v62 }
0x1fac   :  { %v3475_v30 = vrot.slane %v3473_v52, 2 }
0x1fae   :  { %3476 = vrot.lane.b32.xlu0 %v3475_v30, %s4515_s3 }
0x2020   :  { %v3477_v31 = vpop.permute.xlu0 %3476 }
0x2021   :  { %v3479_v0 = vsel %vm154_vm1, %v3473_v52, %v3477_v31 }
0x2022   :  { %4162 = vmatmul.mubr.msk.f32.vlgmr.msra.gmra.mrb[46].mxu1 %vm47_vm0, %v3479_v0 }
0x20f5   :  { %v3561_v33 = vpop.f32.mrb[46].mxu1 }
0x20f6   :  { %v3562_v5 = vadd.f32 %v3561_v33, %v3491_v32  ;;  %v4163_v36 = vpop.f32.mrb[47].mxu1 }
0x20f8   :  { %v3566_v37 = vsel %vm3565_vm12, %v3562_v5, 0.0 }
0x20f9   :  { %3567 = vst [vmem:[%s5432_s5] sm:$0xff] %v3566_v37 }

</bundles_post_ra>
